<compile_context>
chip_gen: v5e
topology: v5e:2x2
jax: 0.10.0
libtpu: 0.0.40
codegen_flags: <defaults>
</compile_context>

<pallas_src>
import numpy as np
import jax
import jax.numpy as jnp
from jax.experimental import pallas as pl
from jax.experimental.pallas import tpu as pltpu


def _round_up(x, m):
    return (x + m - 1) // m * m


# ----------------------------- Pallas kernels -------------------------------

def _conv_relu_pool_kernel(p_ref, w_ref, b_ref, o_ref):
    # p_ref: (4, TM, K) bf16  -- im2col patches, grouped by 2x2 pool quadrant
    # w_ref: (K, Cout)  bf16  -- conv weight flattened for matmul (row order ky, kx, cin)
    # b_ref: (1, Cout)  f32
    # o_ref: (TM, Cout) bf16  -- 2x2-max-pool(relu(conv + bias)) rows (b, i, j)
    q, tm, k = p_ref.shape
    # Single MXU matmul covering all four pool quadrants.  Merging the leading dim is a
    # layout no-op because K stays the lane dim and TM is a multiple of 16.
    y = jnp.dot(p_ref[...].reshape(q * tm, k), w_ref[...],
                preferred_element_type=jnp.float32)
    pooled = jnp.max(y.reshape(q, tm, -1), axis=0)            # 2x2 max-pool on the VPU
    # bias + ReLU after the max: bias is quadrant-invariant and ReLU is monotone.
    o_ref[...] = jnp.maximum(pooled + b_ref[...], 0.0).astype(o_ref.dtype)


def conv_relu_pool(patches_q, w_bf16, b_f32, tm_max):
    # patches_q: (4, M, K) bf16 with M = B*Hp*Wp.  Returns (M, Cout) bf16.
    _, M, K = patches_q.shape
    Cout = w_bf16.shape[1]

    if M >= tm_max:
        # Ragged tail handled by the grid itself (boundary block writes are masked).
        TM, Mp = tm_max, M
    else:
        # Tiny case: single block; round to 16 rows so the in-kernel merge stays layout-free.
        Mp = _round_up(M, 16)
        TM = Mp
        if Mp != M:
            patches_q = jnp.pad(patches_q, ((0, 0), (0, Mp - M), (0, 0)))

    out = pl.pallas_call(
        _conv_relu_pool_kernel,
        out_shape=jax.ShapeDtypeStruct((Mp, Cout), jnp.bfloat16),
        grid=(pl.cdiv(Mp, TM),),
        in_specs=[
            pl.BlockSpec((4, TM, K), lambda i: (0, i, 0)),
            pl.BlockSpec((K, Cout), lambda i: (0, 0)),
            pl.BlockSpec((1, Cout), lambda i: (0, 0)),
        ],
        out_specs=pl.BlockSpec((TM, Cout), lambda i: (i, 0)),
        compiler_params=pltpu.CompilerParams(dimension_semantics=("parallel",)),
    )(patches_q, w_bf16, b_f32)
    return out[:M]


def _mlp_head_kernel(x_ref, w1_ref, b1_ref, w2_ref, b2_ref, o_ref):
    # x: (TB, 1600) bf16, w1: (1600, 128) bf16, w2: (128, 10) bf16, biases f32, out f32.
    h = jnp.dot(x_ref[...], w1_ref[...], preferred_element_type=jnp.float32) + b1_ref[...]
    h = jnp.maximum(h, 0.0)                                           # fc1 + ReLU (f32)
    logits = jnp.dot(h.astype(jnp.bfloat16), w2_ref[...],
                     preferred_element_type=jnp.float32) + b2_ref[...]
    m = jnp.max(logits, axis=1, keepdims=True)                        # stable log_softmax (f32)
    lse = jnp.log(jnp.sum(jnp.exp(logits - m), axis=1, keepdims=True)) + m
    o_ref[...] = logits - lse


def mlp_head(x_bf16, w1_bf16, b1_f32, w2_bf16, b2_f32, tb_max=1024):
    B, D = x_bf16.shape
    H = w1_bf16.shape[1]
    O = w2_bf16.shape[1]

    if B >= tb_max:
        TB, Bp = tb_max, B            # ragged tail handled by masked boundary writes
    else:
        Bp = _round_up(B, 16)
        TB = Bp
        if Bp != B:
            x_bf16 = jnp.pad(x_bf16, ((0, Bp - B), (0, 0)))

    out = pl.pallas_call(
        _mlp_head_kernel,
        out_shape=jax.ShapeDtypeStruct((Bp, O), jnp.float32),
        grid=(pl.cdiv(Bp, TB),),
        in_specs=[
            pl.BlockSpec((TB, D), lambda i: (i, 0)),
            pl.BlockSpec((D, H), lambda i: (0, 0)),
            pl.BlockSpec((1, H), lambda i: (0, 0)),
            pl.BlockSpec((H, O), lambda i: (0, 0)),
            pl.BlockSpec((1, O), lambda i: (0, 0)),
        ],
        out_specs=pl.BlockSpec((TB, O), lambda i: (i, 0)),
        compiler_params=pltpu.CompilerParams(dimension_semantics=("parallel",)),
    )(x_bf16, w1_bf16, b1_f32, w2_bf16, b2_f32)
    return out[:B]


# ------------------------------- JAX glue -----------------------------------

def _im2col3x3_quadrants(x):
    # x: (B, H, W, C) NHWC -> (4, B*Hp*Wp, 9*C) patches grouped by 2x2/stride-2 pool quadrant
    # (floor pooling: only conv-output positions (2i+a, 2j+b), i<Hp, j<Wp are materialized).
    # Feature order within a row is (ky, kx, cin).  Quadrant-first slicing avoids the extra
    # full-resolution (B, Ho, Wo, 9C) intermediate.
    B, H, W, C = x.shape
    Hp, Wp = (H - 2) // 2, (W - 2) // 2
    quads = []
    for a in range(2):
        for b in range(2):
            taps = [x[:, a + dy: a + dy + 2 * Hp: 2, b + dx: b + dx + 2 * Wp: 2, :]
                    for dy in range(3) for dx in range(3)]
            q = jnp.stack(taps, axis=3).reshape(B * Hp * Wp, 9 * C)   # (ky,kx,cin) features
            quads.append(q)
    return jnp.stack(quads, axis=0), Hp, Wp


def _permute_fc1_rows_chw_to_hwc(wf1_chw, C=64, H=5, W=5):
    # PyTorch's x.view(-1, 1600) flattens NCHW -> row index c*H*W + h*W + w.
    # Our NHWC flatten -> row index h*W*C + w*C + c.  Bake the permutation into the weight.
    idx = np.arange(C * H * W).reshape(C, H, W).transpose(1, 2, 0).reshape(-1)
    return wf1_chw[idx]


def init_params(key):
    k = jax.random.split(key, 8)

    def u(kk, shape, fan_in):
        s = 1.0 / np.sqrt(fan_in)
        return jax.random.uniform(kk, shape, jnp.float32, -s, s)

    wf1_chw = u(k[4], (1600, 128), 1600)        # rows in PyTorch (c, h, w) flatten order
    return {
        # weights stored in bf16 once (MXU operand dtype); biases stay f32
        "w1": u(k[0], (9 * 1, 32), 9 * 1).astype(jnp.bfloat16),   # conv1 (9*Cin, Cout)
        "b1": u(k[1], (1, 32), 9 * 1),
        "w2": u(k[2], (9 * 32, 64), 9 * 32).astype(jnp.bfloat16),  # conv2 (9*Cin, Cout)
        "b2": u(k[3], (1, 64), 9 * 32),
        "wf1": _permute_fc1_rows_chw_to_hwc(wf1_chw).astype(jnp.bfloat16),  # (h,w,c)-row order
        "bf1": u(k[5], (1, 128), 1600),
        "wf2": u(k[6], (128, 10), 128).astype(jnp.bfloat16),
        "bf2": u(k[7], (1, 10), 128),
    }


@jax.jit
def digit_cnn_forward(x_nchw, params):
    B = x_nchw.shape[0]
    x = jnp.transpose(x_nchw, (0, 2, 3, 1)).astype(jnp.bfloat16)      # NCHW -> NHWC, bf16

    p1, hp1, wp1 = _im2col3x3_quadrants(x)                             # (4, B*169, 9)
    a1 = conv_relu_pool(p1, params["w1"], params["b1"], tm_max=8192)   # (B*169, 32) bf16
    a1 = a1.reshape(B, hp1, wp1, 32)                                   # (B, 13, 13, 32)

    p2, hp2, wp2 = _im2col3x3_quadrants(a1)                            # (4, B*25, 288)
    a2 = conv_relu_pool(p2, params["w2"], params["b2"], tm_max=1024)   # (B*25, 64) bf16

    flat = a2.reshape(B, hp2 * wp2 * 64)     # NHWC flatten; wf1 rows already permuted to match
    return mlp_head(flat, params["wf1"], params["bf1"], params["wf2"], params["bf2"])


def _reference_forward(x_nchw, params):
    # Pure-JAX f32 reference of the same math (no Pallas, PyTorch relu-then-pool order).
    B = x_nchw.shape[0]
    x = jnp.transpose(x_nchw, (0, 2, 3, 1)).astype(jnp.float32)
    w1 = params["w1"].astype(jnp.float32)
    w2 = params["w2"].astype(jnp.float32)
    wf1 = params["wf1"].astype(jnp.float32)
    wf2 = params["wf2"].astype(jnp.float32)
    p1, hp1, wp1 = _im2col3x3_quadrants(x)
    y1 = jnp.maximum(jnp.einsum("qmk,kc->qmc", p1, w1) + params["b1"], 0.0)
    a1 = jnp.max(y1, axis=0).reshape(B, hp1, wp1, 32)
    p2, hp2, wp2 = _im2col3x3_quadrants(a1)
    y2 = jnp.maximum(jnp.einsum("qmk,kc->qmc", p2, w2) + params["b2"], 0.0)
    a2 = jnp.max(y2, axis=0).reshape(B, hp2 * wp2 * 64)
    h = jnp.maximum(a2 @ wf1 + params["bf1"], 0.0)
    logits = h @ wf2 + params["bf2"]
    return jax.nn.log_softmax(logits, axis=1)


# --------------------------------- main --------------------------------------

if __name__ == "__main__":
    key = jax.random.PRNGKey(0)
    pkey, xkey = jax.random.split(key)
    params = init_params(pkey)
    # 28x28 single-channel input is required by the module (64*5*5 = 1600 flatten); batch = 2.
    x = jax.random.normal(xkey, (2, 1, 28, 28), dtype=jnp.float32)

    out = jax.block_until_ready(digit_cnn_forward(x, params))
    assert out.shape == (2, 10)

    # sanity: log_softmax rows exponentiate-sum to 1 (normalization done in f32)
    assert np.allclose(np.exp(np.asarray(out)).sum(axis=1), 1.0, atol=1e-3)

    # sanity: matches pure-JAX f32 reference up to bf16 activation drift
    ref = np.asarray(_reference_forward(x, params))
    assert np.allclose(np.asarray(out), ref, atol=0.1, rtol=0.1)

    print("KERNEL_OK")
</pallas_src>

<mosaic_0001>
module attributes {stable_mosaic.version = 11 : i64} {
  func.func @_conv_relu_pool_kernel(%arg0: i32, %arg1: memref<4x352x9xbf16, #tpu.memory_space<vmem>>, %arg2: memref<9x32xbf16, #tpu.memory_space<vmem>>, %arg3: memref<1x32xf32, #tpu.memory_space<vmem>>, %arg4: memref<352x32xbf16, #tpu.memory_space<vmem>>) attributes {dimension_semantics = [#tpu.dimension_semantics<parallel>], iteration_bounds = array<i64: 1>, scalar_prefetch = 0 : i64, scratch_operands = 0 : i64, tpu.core_type = #tpu.core_type<tc>, window_params = [{transform_indices = @transform_0, window_bounds = array<i64: 4, 352, 9>}, {pipeline_mode = #tpu.pipeline_mode<synchronous>, transform_indices = @transform_1, window_bounds = array<i64: 9, 32>}, {pipeline_mode = #tpu.pipeline_mode<synchronous>, transform_indices = @transform_2, window_bounds = array<i64: 1, 32>}, {transform_indices = @transform_3, window_bounds = array<i64: 352, 32>}]} {
    %c0 = arith.constant 0 : index
    %c0_0 = arith.constant 0 : index
    %c0_1 = arith.constant 0 : index
    %0 = vector.load %arg1[%c0, %c0_0, %c0_1] : memref<4x352x9xbf16, #tpu.memory_space<vmem>>, vector<4x352x9xbf16>
    %1 = vector.shape_cast %0 : vector<4x352x9xbf16> to vector<1408x9xbf16>
    %c0_2 = arith.constant 0 : index
    %c0_3 = arith.constant 0 : index
    %2 = vector.load %arg2[%c0_2, %c0_3] : memref<9x32xbf16, #tpu.memory_space<vmem>>, vector<9x32xbf16>
    %cst = arith.constant dense<0.000000e+00> : vector<1408x32xf32>
    %3 = tpu.matmul %1, %2, %cst {dimension_numbers = #tpu.dot_dimension_numbers<[1], [0], [0], [1], [0, 0, 1, 1], [], []>} : vector<1408x9xbf16>, vector<9x32xbf16>, vector<1408x32xf32> -> vector<1408x32xf32>
    %4 = vector.shape_cast %3 : vector<1408x32xf32> to vector<4x352x32xf32>
    %cst_4 = arith.constant dense<0xFF800000> : vector<352x32xf32>
    %5 = vector.multi_reduction <maximumf>, %4, %cst_4 [0] : vector<4x352x32xf32> to vector<352x32xf32>
    %c0_5 = arith.constant 0 : index
    %c0_6 = arith.constant 0 : index
    %6 = vector.load %arg3[%c0_5, %c0_6] : memref<1x32xf32, #tpu.memory_space<vmem>>, vector<1x32xf32>
    %7 = vector.broadcast %6 : vector<1x32xf32> to vector<352x32xf32>
    %8 = arith.addf %5, %7 : vector<352x32xf32>
    %cst_7 = arith.constant 0.000000e+00 : f32
    %9 = vector.broadcast %cst_7 : f32 to vector<352x32xf32>
    %10 = arith.maximumf %8, %9 : vector<352x32xf32>
    %11 = arith.truncf %10 : vector<352x32xf32> to vector<352x32xbf16>
    %c0_8 = arith.constant 0 : index
    %c0_9 = arith.constant 0 : index
    %12 = vector.load %arg4[%c0_8, %c0_9] : memref<352x32xbf16, #tpu.memory_space<vmem>>, vector<352x32xbf16>
    tpu.vector_store %arg4[%c0_8, %c0_9], %11 {strides = array<i32>} : memref<352x32xbf16, #tpu.memory_space<vmem>>, vector<352x32xbf16>,
    return
  }
  func.func @transform_0(%arg0: i32) -> (i32, i32, i32) {
    %c0_i32 = arith.constant 0 : i32
    %c0_i32_0 = arith.constant 0 : i32
    %c0_i32_1 = arith.constant 0 : i32
    return %c0_i32, %arg0, %c0_i32_0 : i32, i32, i32
  }
  func.func @transform_1(%arg0: i32) -> (i32, i32) {
    %c0_i32 = arith.constant 0 : i32
    %c0_i32_0 = arith.constant 0 : i32
    %c0_i32_1 = arith.constant 0 : i32
    return %c0_i32, %c0_i32_0 : i32, i32
  }
  func.func @transform_2(%arg0: i32) -> (i32, i32) {
    %c0_i32 = arith.constant 0 : i32
    %c0_i32_0 = arith.constant 0 : i32
    %c0_i32_1 = arith.constant 0 : i32
    return %c0_i32, %c0_i32_0 : i32, i32
  }
  func.func @transform_3(%arg0: i32) -> (i32, i32) {
    %c0_i32 = arith.constant 0 : i32
    %c0_i32_0 = arith.constant 0 : i32
    return %arg0, %c0_i32 : i32, i32
  }
}

module attributes {stable_mosaic.version = 11 : i64} {
  func.func @_conv_relu_pool_kernel(%arg0: i32, %arg1: memref<4x64x288xbf16, #tpu.memory_space<vmem>>, %arg2: memref<288x64xbf16, #tpu.memory_space<vmem>>, %arg3: memref<1x64xf32, #tpu.memory_space<vmem>>, %arg4: memref<64x64xbf16, #tpu.memory_space<vmem>>) attributes {dimension_semantics = [#tpu.dimension_semantics<parallel>], iteration_bounds = array<i64: 1>, scalar_prefetch = 0 : i64, scratch_operands = 0 : i64, tpu.core_type = #tpu.core_type<tc>, window_params = [{transform_indices = @transform_0, window_bounds = array<i64: 4, 64, 288>}, {pipeline_mode = #tpu.pipeline_mode<synchronous>, transform_indices = @transform_1, window_bounds = array<i64: 288, 64>}, {pipeline_mode = #tpu.pipeline_mode<synchronous>, transform_indices = @transform_2, window_bounds = array<i64: 1, 64>}, {transform_indices = @transform_3, window_bounds = array<i64: 64, 64>}]} {
    %c0 = arith.constant 0 : index
    %c0_0 = arith.constant 0 : index
    %c0_1 = arith.constant 0 : index
    %0 = vector.load %arg1[%c0, %c0_0, %c0_1] : memref<4x64x288xbf16, #tpu.memory_space<vmem>>, vector<4x64x288xbf16>
    %1 = vector.shape_cast %0 : vector<4x64x288xbf16> to vector<256x288xbf16>
    %c0_2 = arith.constant 0 : index
    %c0_3 = arith.constant 0 : index
    %2 = vector.load %arg2[%c0_2, %c0_3] : memref<288x64xbf16, #tpu.memory_space<vmem>>, vector<288x64xbf16>
    %cst = arith.constant dense<0.000000e+00> : vector<256x64xf32>
    %3 = tpu.matmul %1, %2, %cst {dimension_numbers = #tpu.dot_dimension_numbers<[1], [0], [0], [1], [0, 0, 1, 1], [], []>} : vector<256x288xbf16>, vector<288x64xbf16>, vector<256x64xf32> -> vector<256x64xf32>
    %4 = vector.shape_cast %3 : vector<256x64xf32> to vector<4x64x64xf32>
    %cst_4 = arith.constant dense<0xFF800000> : vector<64x64xf32>
    %5 = vector.multi_reduction <maximumf>, %4, %cst_4 [0] : vector<4x64x64xf32> to vector<64x64xf32>
    %c0_5 = arith.constant 0 : index
    %c0_6 = arith.constant 0 : index
    %6 = vector.load %arg3[%c0_5, %c0_6] : memref<1x64xf32, #tpu.memory_space<vmem>>, vector<1x64xf32>
    %7 = vector.broadcast %6 : vector<1x64xf32> to vector<64x64xf32>
    %8 = arith.addf %5, %7 : vector<64x64xf32>
    %cst_7 = arith.constant 0.000000e+00 : f32
    %9 = vector.broadcast %cst_7 : f32 to vector<64x64xf32>
    %10 = arith.maximumf %8, %9 : vector<64x64xf32>
    %11 = arith.truncf %10 : vector<64x64xf32> to vector<64x64xbf16>
    %c0_8 = arith.constant 0 : index
    %c0_9 = arith.constant 0 : index
    %12 = vector.load %arg4[%c0_8, %c0_9] : memref<64x64xbf16, #tpu.memory_space<vmem>>, vector<64x64xbf16>
    tpu.vector_store %arg4[%c0_8, %c0_9], %11 {strides = array<i32>} : memref<64x64xbf16, #tpu.memory_space<vmem>>, vector<64x64xbf16>,
    return
  }
  func.func @transform_0(%arg0: i32) -> (i32, i32, i32) {
    %c0_i32 = arith.constant 0 : i32
    %c0_i32_0 = arith.constant 0 : i32
    %c0_i32_1 = arith.constant 0 : i32
    return %c0_i32, %arg0, %c0_i32_0 : i32, i32, i32
  }
  func.func @transform_1(%arg0: i32) -> (i32, i32) {
    %c0_i32 = arith.constant 0 : i32
    %c0_i32_0 = arith.constant 0 : i32
    %c0_i32_1 = arith.constant 0 : i32
    return %c0_i32, %c0_i32_0 : i32, i32
  }
  func.func @transform_2(%arg0: i32) -> (i32, i32) {
    %c0_i32 = arith.constant 0 : i32
    %c0_i32_0 = arith.constant 0 : i32
    %c0_i32_1 = arith.constant 0 : i32
    return %c0_i32, %c0_i32_0 : i32, i32
  }
  func.func @transform_3(%arg0: i32) -> (i32, i32) {
    %c0_i32 = arith.constant 0 : i32
    %c0_i32_0 = arith.constant 0 : i32
    return %arg0, %c0_i32 : i32, i32
  }
}

module attributes {stable_mosaic.version = 11 : i64} {
  func.func @_mlp_head_kernel(%arg0: i32, %arg1: memref<16x1600xbf16, #tpu.memory_space<vmem>>, %arg2: memref<1600x128xbf16, #tpu.memory_space<vmem>>, %arg3: memref<1x128xf32, #tpu.memory_space<vmem>>, %arg4: memref<128x10xbf16, #tpu.memory_space<vmem>>, %arg5: memref<1x10xf32, #tpu.memory_space<vmem>>, %arg6: memref<16x10xf32, #tpu.memory_space<vmem>>) attributes {dimension_semantics = [#tpu.dimension_semantics<parallel>], iteration_bounds = array<i64: 1>, scalar_prefetch = 0 : i64, scratch_operands = 0 : i64, tpu.core_type = #tpu.core_type<tc>, window_params = [{transform_indices = @transform_0, window_bounds = array<i64: 16, 1600>}, {pipeline_mode = #tpu.pipeline_mode<synchronous>, transform_indices = @transform_1, window_bounds = array<i64: 1600, 128>}, {pipeline_mode = #tpu.pipeline_mode<synchronous>, transform_indices = @transform_2, window_bounds = array<i64: 1, 128>}, {pipeline_mode = #tpu.pipeline_mode<synchronous>, transform_indices = @transform_3, window_bounds = array<i64: 128, 10>}, {pipeline_mode = #tpu.pipeline_mode<synchronous>, transform_indices = @transform_4, window_bounds = array<i64: 1, 10>}, {transform_indices = @transform_5, window_bounds = array<i64: 16, 10>}]} {
    %c0 = arith.constant 0 : index
    %c0_0 = arith.constant 0 : index
    %0 = vector.load %arg1[%c0, %c0_0] : memref<16x1600xbf16, #tpu.memory_space<vmem>>, vector<16x1600xbf16>
    %c0_1 = arith.constant 0 : index
    %c0_2 = arith.constant 0 : index
    %1 = vector.load %arg2[%c0_1, %c0_2] : memref<1600x128xbf16, #tpu.memory_space<vmem>>, vector<1600x128xbf16>
    %cst = arith.constant dense<0.000000e+00> : vector<16x128xf32>
    %2 = tpu.matmul %0, %1, %cst {dimension_numbers = #tpu.dot_dimension_numbers<[1], [0], [0], [1], [0, 0, 1, 1], [], []>} : vector<16x1600xbf16>, vector<1600x128xbf16>, vector<16x128xf32> -> vector<16x128xf32>
    %c0_3 = arith.constant 0 : index
    %c0_4 = arith.constant 0 : index
    %3 = vector.load %arg3[%c0_3, %c0_4] : memref<1x128xf32, #tpu.memory_space<vmem>>, vector<1x128xf32>
    %4 = vector.broadcast %3 : vector<1x128xf32> to vector<16x128xf32>
    %5 = arith.addf %2, %4 : vector<16x128xf32>
    %cst_5 = arith.constant 0.000000e+00 : f32
    %6 = vector.broadcast %cst_5 : f32 to vector<16x128xf32>
    %7 = arith.maximumf %5, %6 : vector<16x128xf32>
    %8 = arith.truncf %7 : vector<16x128xf32> to vector<16x128xbf16>
    %c0_6 = arith.constant 0 : index
    %c0_7 = arith.constant 0 : index
    %9 = vector.load %arg4[%c0_6, %c0_7] : memref<128x10xbf16, #tpu.memory_space<vmem>>, vector<128x10xbf16>
    %cst_8 = arith.constant dense<0.000000e+00> : vector<16x10xf32>
    %10 = tpu.matmul %8, %9, %cst_8 {dimension_numbers = #tpu.dot_dimension_numbers<[1], [0], [0], [1], [0, 0, 1, 1], [], []>} : vector<16x128xbf16>, vector<128x10xbf16>, vector<16x10xf32> -> vector<16x10xf32>
    %c0_9 = arith.constant 0 : index
    %c0_10 = arith.constant 0 : index
    %11 = vector.load %arg5[%c0_9, %c0_10] : memref<1x10xf32, #tpu.memory_space<vmem>>, vector<1x10xf32>
    %12 = vector.broadcast %11 : vector<1x10xf32> to vector<16x10xf32>
    %13 = arith.addf %10, %12 : vector<16x10xf32>
    %cst_11 = arith.constant dense<0xFF800000> : vector<16xf32>
    %14 = vector.multi_reduction <maximumf>, %13, %cst_11 [1] : vector<16x10xf32> to vector<16xf32>
    %15 = vector.shape_cast %14 : vector<16xf32> to vector<16x1xf32>
    %16 = vector.broadcast %15 : vector<16x1xf32> to vector<16x10xf32>
    %17 = arith.subf %13, %16 : vector<16x10xf32>
    %18 = math.exp %17 : vector<16x10xf32>
    %cst_12 = arith.constant dense<0.000000e+00> : vector<16xf32>
    %19 = vector.multi_reduction <add>, %18, %cst_12 [1] : vector<16x10xf32> to vector<16xf32>
    %20 = vector.shape_cast %19 : vector<16xf32> to vector<16x1xf32>
    %21 = math.log %20 : vector<16x1xf32>
    %22 = arith.addf %21, %15 : vector<16x1xf32>
    %23 = vector.broadcast %22 : vector<16x1xf32> to vector<16x10xf32>
    %24 = arith.subf %13, %23 : vector<16x10xf32>
    %c0_13 = arith.constant 0 : index
    %c0_14 = arith.constant 0 : index
    %25 = vector.load %arg6[%c0_13, %c0_14] : memref<16x10xf32, #tpu.memory_space<vmem>>, vector<16x10xf32>
    tpu.vector_store %arg6[%c0_13, %c0_14], %24 {strides = array<i32>} : memref<16x10xf32, #tpu.memory_space<vmem>>, vector<16x10xf32>,
    return
  }
  func.func @transform_0(%arg0: i32) -> (i32, i32) {
    %c0_i32 = arith.constant 0 : i32
    %c0_i32_0 = arith.constant 0 : i32
    return %arg0, %c0_i32 : i32, i32
  }
  func.func @transform_1(%arg0: i32) -> (i32, i32) {
    %c0_i32 = arith.constant 0 : i32
    %c0_i32_0 = arith.constant 0 : i32
    %c0_i32_1 = arith.constant 0 : i32
    return %c0_i32, %c0_i32_0 : i32, i32
  }
  func.func @transform_2(%arg0: i32) -> (i32, i32) {
    %c0_i32 = arith.constant 0 : i32
    %c0_i32_0 = arith.constant 0 : i32
    %c0_i32_1 = arith.constant 0 : i32
    return %c0_i32, %c0_i32_0 : i32, i32
  }
  func.func @transform_3(%arg0: i32) -> (i32, i32) {
    %c0_i32 = arith.constant 0 : i32
    %c0_i32_0 = arith.constant 0 : i32
    %c0_i32_1 = arith.constant 0 : i32
    return %c0_i32, %c0_i32_0 : i32, i32
  }
  func.func @transform_4(%arg0: i32) -> (i32, i32) {
    %c0_i32 = arith.constant 0 : i32
    %c0_i32_0 = arith.constant 0 : i32
    %c0_i32_1 = arith.constant 0 : i32
    return %c0_i32, %c0_i32_0 : i32, i32
  }
  func.func @transform_5(%arg0: i32) -> (i32, i32) {
    %c0_i32 = arith.constant 0 : i32
    %c0_i32_0 = arith.constant 0 : i32
    return %arg0, %c0_i32 : i32, i32
  }
}

</mosaic_0001>

<bundles_post_ra>
// kernel: digit_cnn_forward.3
= control target key start
LH: loop header
LB: loop body
LE: loop exit
PB: predicated region body
PF: predicated region fallthrough
CT: control target
= control target key end

     0   :  { %vm903_vm0 = vcmask 1043456   ;;  %vm904_vm1 = vcmask 1044480   ;;  %v2392_v2 = vmov 65535   ;;  %vm638_vm2 = vcmask 72704   ;;  %s3177_s1 = inlined_call_operand.vmem [shape: bf16[9,32], index: 1, kind: input, shape index: {}]   ;;  %s3178_s0 = inlined_call_operand.vmem [shape: bf16[4,352,9], index: 0, kind: input, shape index: {}]   ;;  %s3179_s2 = inlined_call_operand.vmem [shape: f32[1,32], index: 2, kind: input, shape index: {}]   ;;  %s3180_s3 = inlined_call_operand.vmem [shape: bf16[352,32], index: 3, kind: output, shape index: {}]  }
   0x1   :  { %v2207_v0 = vld [vmem:[%s3177_s1] sm:$0xf]  ;;  %v2385_v1 = vld [vmem:[%s3177_s1] sm:$0x10]  ;;  %v905_v3 = vsel %vm903_vm0, 4294967295, %v2392_v2  ;;  %v2319_v8 = vld [vmem:[%s3178_s0 + $0xb0] sm:$0xff] }
   0x2   :  { %v2208_v4 = vor.u32 %v2385_v1, %v2207_v0  ;;  %v906_v5 = vsel %vm904_vm1, %v905_v3, 0  ;;  %v2297_v7 = vld [vmem:[%s3178_s0] sm:$0xff]  ;;  %v2363_v10 = vld [vmem:[%s3178_s0 + $0x210] sm:$0xff]  ;;  %v2298_v11 = vld [vmem:[%s3178_s0 + $0x8] sm:$0xff]  ;;  %vm1359_vm3 = vcmask 261120   ;;  %vm1804_vm4 = vcmask 257024  }
   0x3   :  { %v2341_v9 = vld [vmem:[%s3178_s0 + $0x160] sm:$0xff]  ;;  %v2320_v12 = vld [vmem:[%s3178_s0 + $0xb8] sm:$0xff]  ;;  %v2342_v13 = vld [vmem:[%s3178_s0 + $0x168] sm:$0xff] }
   0x4   :  { %v908_v6 = vand.u32 %v2208_v4, %v906_v5  ;;  %v2364_v14 = vld [vmem:[%s3178_s0 + $0x218] sm:$0xff]  ;;  %v2299_v15 = vld [vmem:[%s3178_s0 + $0x10] sm:$0xff]  ;;  %v2321_v16 = vld [vmem:[%s3178_s0 + $0xc0] sm:$0xff] }
   0x5   :  { %v2343_v17 = vld [vmem:[%s3178_s0 + $0x170] sm:$0xff]  ;;  %v2365_v18 = vld [vmem:[%s3178_s0 + $0x220] sm:$0xff]  ;;  %v2300_v19 = vld [vmem:[%s3178_s0 + $0x18] sm:$0xff] }
   0x6   :  { %917 = vmatpush.bf16.msra.mxu0 %v908_v6  ;;  %2386 = vmatpush.bf16.msra.mxu1 %v908_v6  ;;  %v2322_v20 = vld [vmem:[%s3178_s0 + $0xc8] sm:$0xff]  ;;  %v2344_v21 = vld [vmem:[%s3178_s0 + $0x178] sm:$0xff]  ;;  %v2301_v23 = vld [vmem:[%s3178_s0 + $0x20] sm:$0xff] }
   0x7   :  { %2387 = vmatpush.bf16.msra.mxu2 %v908_v6  ;;  %2388 = vmatpush.bf16.msra.mxu3 %v908_v6  ;;  %v2366_v22 = vld [vmem:[%s3178_s0 + $0x228] sm:$0xff]  ;;  %v2323_v24 = vld [vmem:[%s3178_s0 + $0xd0] sm:$0xff]  ;;  %v2345_v25 = vld [vmem:[%s3178_s0 + $0x180] sm:$0xff] }
   0x8   :  { %v2367_v26 = vld [vmem:[%s3178_s0 + $0x230] sm:$0xff]  ;;  %v2302_v27 = vld [vmem:[%s3178_s0 + $0x28] sm:$0xff]  ;;  %v2324_v28 = vld [vmem:[%s3178_s0 + $0xd8] sm:$0xff] }
   0x9   :  { %2209 = vmatmul.msk.bf16.vlgmr.msra.gmra.mxu0 %vm638_vm2, %v2297_v7  ;;  %2231 = vmatmul.msk.bf16.vlgmr.msra.gmra.mxu1 %vm638_vm2, %v2319_v8  ;;  %v2346_v29 = vld [vmem:[%s3178_s0 + $0x188] sm:$0xff]  ;;  %v2368_v30 = vld [vmem:[%s3178_s0 + $0x238] sm:$0xff]  ;;  %v2303_v31 = vld [vmem:[%s3178_s0 + $0x30] sm:$0xff] }
   0xa   :  { %2253 = vmatmul.msk.bf16.vlgmr.msra.gmra.mxu2 %vm638_vm2, %v2341_v9  ;;  %2275 = vmatmul.msk.bf16.vlgmr.msra.gmra.mxu3 %vm638_vm2, %v2363_v10  ;;  %v2325_v32 = vld [vmem:[%s3178_s0 + $0xe0] sm:$0xff]  ;;  %v2347_v33 = vld [vmem:[%s3178_s0 + $0x190] sm:$0xff]  ;;  %v2304_v35 = vld [vmem:[%s3178_s0 + $0x38] sm:$0xff] }
   0xb   :  { %v2369_v34 = vld [vmem:[%s3178_s0 + $0x240] sm:$0xff]  ;;  %v2326_v36 = vld [vmem:[%s3178_s0 + $0xe8] sm:$0xff]  ;;  %v2348_v37 = vld [vmem:[%s3178_s0 + $0x198] sm:$0xff] }
   0xc   :  { %v2370_v38 = vld [vmem:[%s3178_s0 + $0x248] sm:$0xff]  ;;  %v2305_v39 = vld [vmem:[%s3178_s0 + $0x40] sm:$0xff]  ;;  %v2327_v40 = vld [vmem:[%s3178_s0 + $0xf0] sm:$0xff] }
   0xd   :  { %v2349_v43 = vld [vmem:[%s3178_s0 + $0x1a0] sm:$0xff]  ;;  %v2371_v44 = vld [vmem:[%s3178_s0 + $0x250] sm:$0xff]  ;;  %v2306_v0 = vld [vmem:[%s3178_s0 + $0x48] sm:$0xff] }
   0xe   :  { %v2570_v55 = vld [vmem:[%s3179_s2] ss:$0 sm:$0xff]  ;;  %v2328_v1 = vld [vmem:[%s3178_s0 + $0xf8] sm:$0xff]  ;;  %v2350_v5 = vld [vmem:[%s3178_s0 + $0x1a8] sm:$0xff] }
   0xf   :  { %v2372_v6 = vld [vmem:[%s3178_s0 + $0x258] sm:$0xff] }
  0x19   :  { %2210 = vmatmul.msk.bf16.gmra.mxu0 %vm638_vm2, %v2298_v11  ;;  %2232 = vmatmul.msk.bf16.gmra.mxu1 %vm638_vm2, %v2320_v12 }
  0x1a   :  { %2254 = vmatmul.msk.bf16.gmra.mxu2 %vm638_vm2, %v2342_v13  ;;  %2276 = vmatmul.msk.bf16.gmra.mxu3 %vm638_vm2, %v2364_v14 }
  0x29   :  { %2211 = vmatmul.msk.bf16.gmra.mxu0 %vm638_vm2, %v2299_v15  ;;  %2233 = vmatmul.msk.bf16.gmra.mxu1 %vm638_vm2, %v2321_v16 }
  0x2a   :  { %2255 = vmatmul.msk.bf16.gmra.mxu2 %vm638_vm2, %v2343_v17  ;;  %2277 = vmatmul.msk.bf16.gmra.mxu3 %vm638_vm2, %v2365_v18 }
  0x39   :  { %2212 = vmatmul.msk.bf16.gmra.mxu0 %vm638_vm2, %v2300_v19  ;;  %2234 = vmatmul.msk.bf16.gmra.mxu1 %vm638_vm2, %v2322_v20 }
  0x3a   :  { %2256 = vmatmul.msk.bf16.gmra.mxu2 %vm638_vm2, %v2344_v21  ;;  %2278 = vmatmul.msk.bf16.gmra.mxu3 %vm638_vm2, %v2366_v22 }
  0x49   :  { %2213 = vmatmul.msk.bf16.gmra.mxu0 %vm638_vm2, %v2301_v23  ;;  %2235 = vmatmul.msk.bf16.gmra.mxu1 %vm638_vm2, %v2323_v24 }
  0x4a   :  { %2257 = vmatmul.msk.bf16.gmra.mxu2 %vm638_vm2, %v2345_v25  ;;  %2279 = vmatmul.msk.bf16.gmra.mxu3 %vm638_vm2, %v2367_v26 }
  0x59   :  { %2214 = vmatmul.msk.bf16.gmra.mxu0 %vm638_vm2, %v2302_v27  ;;  %2236 = vmatmul.msk.bf16.gmra.mxu1 %vm638_vm2, %v2324_v28 }
  0x5a   :  { %2258 = vmatmul.msk.bf16.gmra.mxu2 %vm638_vm2, %v2346_v29  ;;  %2280 = vmatmul.msk.bf16.gmra.mxu3 %vm638_vm2, %v2368_v30 }
  0x69   :  { %2215 = vmatmul.msk.bf16.gmra.mxu0 %vm638_vm2, %v2303_v31  ;;  %2237 = vmatmul.msk.bf16.gmra.mxu1 %vm638_vm2, %v2325_v32  ;;  %v2307_v32 = vld [vmem:[%s3178_s0 + $0x50] sm:$0xff] }
  0x6a   :  { %2259 = vmatmul.msk.bf16.gmra.mxu2 %vm638_vm2, %v2347_v33  ;;  %2281 = vmatmul.msk.bf16.gmra.mxu3 %vm638_vm2, %v2369_v34  ;;  %v2329_v33 = vld [vmem:[%s3178_s0 + $0x100] sm:$0xff] }
  0x79   :  { %2216 = vmatmul.msk.bf16.gmra.mxu0 %vm638_vm2, %v2304_v35  ;;  %2238 = vmatmul.msk.bf16.gmra.mxu1 %vm638_vm2, %v2326_v36 }
  0x7a   :  { %2260 = vmatmul.msk.bf16.gmra.mxu2 %vm638_vm2, %v2348_v37  ;;  %2282 = vmatmul.msk.bf16.gmra.mxu3 %vm638_vm2, %v2370_v38  ;;  %v2351_v37 = vld [vmem:[%s3178_s0 + $0x1b0] sm:$0xff]  ;;  %v2373_v38 = vld [vmem:[%s3178_s0 + $0x260] sm:$0xff] }
  0x86   :  { %v919_v41 = vpop.f32.mrf.mxu0  ;;  %v1029_v42 = vpop.f32.mrf.mxu1 }
  0x87   :  { %v1360_v45 = vsel %vm1359_vm3, %v919_v41, -inf  ;;  %v1361_v46 = vsel %vm1359_vm3, %v1029_v42, -inf }
  0x88   :  { %v1362_v47 = vmax.f32 %v1360_v45, %v1361_v46 }
  0x89   :  { %2217 = vmatmul.msk.bf16.gmra.mxu0 %vm638_vm2, %v2305_v39  ;;  %2239 = vmatmul.msk.bf16.gmra.mxu1 %vm638_vm2, %v2327_v40 }
  0x8a   :  { %2261 = vmatmul.msk.bf16.gmra.mxu2 %vm638_vm2, %v2349_v43  ;;  %2283 = vmatmul.msk.bf16.gmra.mxu3 %vm638_vm2, %v2371_v44 }
  0x8d   :  { %v1139_v48 = vpop.f32.mrf.mxu2  ;;  %v1249_v49 = vpop.f32.mrf.mxu3 }
  0x8e   :  { %v1363_v50 = vsel %vm1359_vm3, %v1139_v48, -inf  ;;  %v1365_v51 = vsel %vm1359_vm3, %v1249_v49, -inf  ;;  %v921_v52 = vpop.f32.mrf.mxu0  ;;  %v1031_v53 = vpop.f32.mrf.mxu1 }
  0x8f   :  { %v1364_v54 = vmax.f32 %v1362_v47, %v1363_v50  ;;  %v1367_v57 = vsel %vm1359_vm3, %v921_v52, -inf  ;;  %v1368_v58 = vsel %vm1359_vm3, %v1031_v53, -inf }
  0x90   :  { %v1369_v61 = vmax.f32 %v1367_v57, %v1368_v58 }
  0x91   :  { %v1366_v56 = vmax.f32 %v1364_v54, %v1365_v51 }
  0x93   :  { %v1672_v59 = vadd.f32 %v2570_v55, %v1366_v56 }
  0x95   :  { %v1716_v60 = vmax.f32 %v1672_v59, 0.0  ;;  %v1141_v62 = vpop.f32.mrf.mxu2  ;;  %v1251_v63 = vpop.f32.mrf.mxu3 }
  0x96   :  { %v1370_v2 = vsel %vm1359_vm3, %v1141_v62, -inf  ;;  %v924_v3 = vpop.f32.mrf.mxu0  ;;  %v1034_v4 = vpop.f32.mrf.mxu1  ;;  %v1372_v9 = vsel %vm1359_vm3, %v1251_v63, -inf }
  0x97   :  { %v1760_v7 = vpack.c.bf16 %v1716_v60, %v1716_v60  ;;  %v1371_v8 = vmax.f32 %v1369_v61, %v1370_v2  ;;  %v1374_v10 = vsel %vm1359_vm3, %v924_v3, -inf  ;;  %v1375_v11 = vsel %vm1359_vm3, %v1034_v4, -inf  ;;  %v2330_v2 = vld [vmem:[%s3178_s0 + $0x108] sm:$0xff] }
  0x98   :  { %v1376_v14 = vmax.f32 %v1374_v10, %v1375_v11 }
  0x99   :  { %1805 = vst.msk [vmem:[%s3180_s3] sm:$0xf] %vm1804_vm4, %v1760_v7  ;;  %v1373_v12 = vmax.f32 %v1371_v8, %v1372_v9  ;;  %2218 = vmatmul.msk.bf16.gmra.mxu0 %vm638_vm2, %v2306_v0  ;;  %2240 = vmatmul.msk.bf16.gmra.mxu1 %vm638_vm2, %v2328_v1  ;;  %v2308_v1 = vld [vmem:[%s3178_s0 + $0x58] sm:$0xff]  ;;  %v2374_v7 = vld [vmem:[%s3178_s0 + $0x268] sm:$0xff] }
  0x9a   :  { %2262 = vmatmul.msk.bf16.gmra.mxu2 %vm638_vm2, %v2350_v5  ;;  %2284 = vmatmul.msk.bf16.gmra.mxu3 %vm638_vm2, %v2372_v6  ;;  %v2352_v6 = vld [vmem:[%s3178_s0 + $0x1b8] sm:$0xff] }
  0x9b   :  { %v1673_v13 = vadd.f32 %v2570_v55, %v1373_v12 }
  0x9d   :  { %v1717_v15 = vmax.f32 %v1673_v13, 0.0  ;;  %v1144_v16 = vpop.f32.mrf.mxu2  ;;  %v1254_v17 = vpop.f32.mrf.mxu3 }
  0x9e   :  { %v1377_v18 = vsel %vm1359_vm3, %v1144_v16, -inf  ;;  %v1379_v19 = vsel %vm1359_vm3, %v1254_v17, -inf  ;;  %v926_v20 = vpop.f32.mrf.mxu0  ;;  %v1036_v21 = vpop.f32.mrf.mxu1 }
  0x9f   :  { %v1761_v22 = vpack.c.bf16 %v1717_v15, %v1717_v15  ;;  %v1378_v23 = vmax.f32 %v1376_v14, %v1377_v18  ;;  %v1381_v25 = vsel %vm1359_vm3, %v926_v20, -inf  ;;  %v1382_v26 = vsel %vm1359_vm3, %v1036_v21, -inf }
  0xa0   :  { %v1383_v29 = vmax.f32 %v1381_v25, %v1382_v26 }
  0xa1   :  { %1806 = vst.msk [vmem:[%s3180_s3 + $0x4] sm:$0xf] %vm1804_vm4, %v1761_v22  ;;  %v1380_v24 = vmax.f32 %v1378_v23, %v1379_v19 }
  0xa3   :  { %v1674_v27 = vadd.f32 %v2570_v55, %v1380_v24 }
  0xa5   :  { %v1718_v28 = vmax.f32 %v1674_v27, 0.0  ;;  %v1146_v30 = vpop.f32.mrf.mxu2  ;;  %v1256_v31 = vpop.f32.mrf.mxu3 }
  0xa6   :  { %v1384_v34 = vsel %vm1359_vm3, %v1146_v30, -inf  ;;  %v929_v35 = vpop.f32.mrf.mxu0  ;;  %v1039_v36 = vpop.f32.mrf.mxu1  ;;  %v1386_v41 = vsel %vm1359_vm3, %v1256_v31, -inf }
  0xa7   :  { %v1762_v39 = vpack.c.bf16 %v1718_v28, %v1718_v28  ;;  %v1385_v40 = vmax.f32 %v1383_v29, %v1384_v34  ;;  %v1388_v42 = vsel %vm1359_vm3, %v929_v35, -inf  ;;  %v1389_v43 = vsel %vm1359_vm3, %v1039_v36, -inf  ;;  %v2331_v34 = vld [vmem:[%s3178_s0 + $0x110] sm:$0xff] }
  0xa8   :  { %v1390_v46 = vmax.f32 %v1388_v42, %v1389_v43 }
  0xa9   :  { %1807 = vst.msk [vmem:[%s3180_s3 + $0x8] sm:$0xf] %vm1804_vm4, %v1762_v39  ;;  %v1387_v44 = vmax.f32 %v1385_v40, %v1386_v41  ;;  %2219 = vmatmul.msk.bf16.gmra.mxu0 %vm638_vm2, %v2307_v32  ;;  %2241 = vmatmul.msk.bf16.gmra.mxu1 %vm638_vm2, %v2329_v33  ;;  %v2309_v33 = vld [vmem:[%s3178_s0 + $0x60] sm:$0xff]  ;;  %v2375_v39 = vld [vmem:[%s3178_s0 + $0x270] sm:$0xff] }
  0xaa   :  { %2263 = vmatmul.msk.bf16.gmra.mxu2 %vm638_vm2, %v2351_v37  ;;  %2285 = vmatmul.msk.bf16.gmra.mxu3 %vm638_vm2, %v2373_v38  ;;  %v2353_v38 = vld [vmem:[%s3178_s0 + $0x1c0] sm:$0xff] }
  0xab   :  { %v1675_v45 = vadd.f32 %v2570_v55, %v1387_v44 }
  0xad   :  { %v1719_v47 = vmax.f32 %v1675_v45, 0.0  ;;  %v1149_v48 = vpop.f32.mrf.mxu2  ;;  %v1259_v49 = vpop.f32.mrf.mxu3 }
  0xae   :  { %v1391_v50 = vsel %vm1359_vm3, %v1149_v48, -inf  ;;  %v1393_v51 = vsel %vm1359_vm3, %v1259_v49, -inf  ;;  %v931_v52 = vpop.f32.mrf.mxu0  ;;  %v1041_v53 = vpop.f32.mrf.mxu1 }
  0xaf   :  { %v1763_v54 = vpack.c.bf16 %v1719_v47, %v1719_v47  ;;  %v1392_v56 = vmax.f32 %v1390_v46, %v1391_v50  ;;  %v1395_v58 = vsel %vm1359_vm3, %v931_v52, -inf  ;;  %v1396_v59 = vsel %vm1359_vm3, %v1041_v53, -inf }
  0xb0   :  { %v1397_v62 = vmax.f32 %v1395_v58, %v1396_v59 }
  0xb1   :  { %1808 = vst.msk [vmem:[%s3180_s3 + $0xc] sm:$0xf] %vm1804_vm4, %v1763_v54  ;;  %v1394_v57 = vmax.f32 %v1392_v56, %v1393_v51 }
  0xb3   :  { %v1676_v60 = vadd.f32 %v2570_v55, %v1394_v57 }
  0xb5   :  { %v1720_v61 = vmax.f32 %v1676_v60, 0.0  ;;  %v1151_v63 = vpop.f32.mrf.mxu2  ;;  %v1261_v0 = vpop.f32.mrf.mxu3 }
  0xb6   :  { %v1398_v3 = vsel %vm1359_vm3, %v1151_v63, -inf  ;;  %v934_v4 = vpop.f32.mrf.mxu0  ;;  %v1044_v5 = vpop.f32.mrf.mxu1  ;;  %v1400_v10 = vsel %vm1359_vm3, %v1261_v0, -inf }
  0xb7   :  { %v1764_v8 = vpack.c.bf16 %v1720_v61, %v1720_v61  ;;  %v1399_v9 = vmax.f32 %v1397_v62, %v1398_v3  ;;  %v1402_v11 = vsel %vm1359_vm3, %v934_v4, -inf  ;;  %v1403_v12 = vsel %vm1359_vm3, %v1044_v5, -inf  ;;  %v2332_v3 = vld [vmem:[%s3178_s0 + $0x118] sm:$0xff] }
  0xb8   :  { %v1404_v15 = vmax.f32 %v1402_v11, %v1403_v12 }
  0xb9   :  { %1809 = vst.msk [vmem:[%s3180_s3 + $0x10] sm:$0xf] %vm1804_vm4, %v1764_v8  ;;  %v1401_v13 = vmax.f32 %v1399_v9, %v1400_v10  ;;  %2220 = vmatmul.msk.bf16.gmra.mxu0 %vm638_vm2, %v2308_v1  ;;  %2242 = vmatmul.msk.bf16.gmra.mxu1 %vm638_vm2, %v2330_v2  ;;  %v2310_v2 = vld [vmem:[%s3178_s0 + $0x68] sm:$0xff]  ;;  %v2376_v8 = vld [vmem:[%s3178_s0 + $0x278] sm:$0xff] }
  0xba   :  { %2264 = vmatmul.msk.bf16.gmra.mxu2 %vm638_vm2, %v2352_v6  ;;  %2286 = vmatmul.msk.bf16.gmra.mxu3 %vm638_vm2, %v2374_v7  ;;  %v2354_v7 = vld [vmem:[%s3178_s0 + $0x1c8] sm:$0xff] }
  0xbb   :  { %v1677_v14 = vadd.f32 %v2570_v55, %v1401_v13 }
  0xbd   :  { %v1721_v16 = vmax.f32 %v1677_v14, 0.0  ;;  %v1154_v17 = vpop.f32.mrf.mxu2  ;;  %v1264_v18 = vpop.f32.mrf.mxu3 }
  0xbe   :  { %v1405_v19 = vsel %vm1359_vm3, %v1154_v17, -inf  ;;  %v1407_v20 = vsel %vm1359_vm3, %v1264_v18, -inf  ;;  %v936_v21 = vpop.f32.mrf.mxu0  ;;  %v1046_v22 = vpop.f32.mrf.mxu1 }
  0xbf   :  { %v1765_v23 = vpack.c.bf16 %v1721_v16, %v1721_v16  ;;  %v1406_v24 = vmax.f32 %v1404_v15, %v1405_v19  ;;  %v1409_v26 = vsel %vm1359_vm3, %v936_v21, -inf  ;;  %v1410_v27 = vsel %vm1359_vm3, %v1046_v22, -inf }
  0xc0   :  { %v1411_v30 = vmax.f32 %v1409_v26, %v1410_v27 }
  0xc1   :  { %1810 = vst.msk [vmem:[%s3180_s3 + $0x14] sm:$0xf] %vm1804_vm4, %v1765_v23  ;;  %v1408_v25 = vmax.f32 %v1406_v24, %v1407_v20 }
  0xc3   :  { %v1678_v28 = vadd.f32 %v2570_v55, %v1408_v25 }
  0xc5   :  { %v1722_v29 = vmax.f32 %v1678_v28, 0.0  ;;  %v1156_v31 = vpop.f32.mrf.mxu2  ;;  %v1266_v32 = vpop.f32.mrf.mxu3 }
  0xc6   :  { %v1412_v35 = vsel %vm1359_vm3, %v1156_v31, -inf  ;;  %v939_v36 = vpop.f32.mrf.mxu0  ;;  %v1049_v37 = vpop.f32.mrf.mxu1  ;;  %v1414_v42 = vsel %vm1359_vm3, %v1266_v32, -inf }
  0xc7   :  { %v1766_v40 = vpack.c.bf16 %v1722_v29, %v1722_v29  ;;  %v1413_v41 = vmax.f32 %v1411_v30, %v1412_v35  ;;  %v1416_v43 = vsel %vm1359_vm3, %v939_v36, -inf  ;;  %v1417_v44 = vsel %vm1359_vm3, %v1049_v37, -inf  ;;  %v2333_v35 = vld [vmem:[%s3178_s0 + $0x120] sm:$0xff] }
  0xc8   :  { %v1418_v47 = vmax.f32 %v1416_v43, %v1417_v44 }
  0xc9   :  { %1811 = vst.msk [vmem:[%s3180_s3 + $0x18] sm:$0xf] %vm1804_vm4, %v1766_v40  ;;  %v1415_v45 = vmax.f32 %v1413_v41, %v1414_v42  ;;  %2221 = vmatmul.msk.bf16.gmra.mxu0 %vm638_vm2, %v2309_v33  ;;  %2243 = vmatmul.msk.bf16.gmra.mxu1 %vm638_vm2, %v2331_v34  ;;  %v2311_v34 = vld [vmem:[%s3178_s0 + $0x70] sm:$0xff]  ;;  %v2377_v40 = vld [vmem:[%s3178_s0 + $0x280] sm:$0xff] }
  0xca   :  { %2265 = vmatmul.msk.bf16.gmra.mxu2 %vm638_vm2, %v2353_v38  ;;  %2287 = vmatmul.msk.bf16.gmra.mxu3 %vm638_vm2, %v2375_v39  ;;  %v2355_v39 = vld [vmem:[%s3178_s0 + $0x1d0] sm:$0xff] }
  0xcb   :  { %v1679_v46 = vadd.f32 %v2570_v55, %v1415_v45 }
  0xcd   :  { %v1723_v48 = vmax.f32 %v1679_v46, 0.0  ;;  %v1159_v49 = vpop.f32.mrf.mxu2  ;;  %v1269_v50 = vpop.f32.mrf.mxu3 }
  0xce   :  { %v1419_v51 = vsel %vm1359_vm3, %v1159_v49, -inf  ;;  %v1421_v52 = vsel %vm1359_vm3, %v1269_v50, -inf  ;;  %v941_v53 = vpop.f32.mrf.mxu0  ;;  %v1051_v54 = vpop.f32.mrf.mxu1 }
  0xcf   :  { %v1767_v56 = vpack.c.bf16 %v1723_v48, %v1723_v48  ;;  %v1420_v57 = vmax.f32 %v1418_v47, %v1419_v51  ;;  %v1423_v59 = vsel %vm1359_vm3, %v941_v53, -inf  ;;  %v1424_v60 = vsel %vm1359_vm3, %v1051_v54, -inf }
  0xd0   :  { %v1425_v63 = vmax.f32 %v1423_v59, %v1424_v60 }
  0xd1   :  { %1812 = vst.msk [vmem:[%s3180_s3 + $0x1c] sm:$0xf] %vm1804_vm4, %v1767_v56  ;;  %v1422_v58 = vmax.f32 %v1420_v57, %v1421_v52 }
  0xd3   :  { %v1680_v61 = vadd.f32 %v2570_v55, %v1422_v58 }
  0xd5   :  { %v1724_v62 = vmax.f32 %v1680_v61, 0.0  ;;  %v1161_v0 = vpop.f32.mrf.mxu2  ;;  %v1271_v1 = vpop.f32.mrf.mxu3 }
  0xd6   :  { %v1426_v4 = vsel %vm1359_vm3, %v1161_v0, -inf  ;;  %v944_v5 = vpop.f32.mrf.mxu0  ;;  %v1054_v6 = vpop.f32.mrf.mxu1  ;;  %v1428_v11 = vsel %vm1359_vm3, %v1271_v1, -inf }
  0xd7   :  { %v1768_v9 = vpack.c.bf16 %v1724_v62, %v1724_v62  ;;  %v1427_v10 = vmax.f32 %v1425_v63, %v1426_v4  ;;  %v1430_v12 = vsel %vm1359_vm3, %v944_v5, -inf  ;;  %v1431_v13 = vsel %vm1359_vm3, %v1054_v6, -inf  ;;  %v2334_v4 = vld [vmem:[%s3178_s0 + $0x128] sm:$0xff] }
  0xd8   :  { %v1432_v16 = vmax.f32 %v1430_v12, %v1431_v13 }
  0xd9   :  { %1813 = vst.msk [vmem:[%s3180_s3 + $0x20] sm:$0xf] %vm1804_vm4, %v1768_v9  ;;  %v1429_v14 = vmax.f32 %v1427_v10, %v1428_v11  ;;  %2222 = vmatmul.msk.bf16.gmra.mxu0 %vm638_vm2, %v2310_v2  ;;  %2244 = vmatmul.msk.bf16.gmra.mxu1 %vm638_vm2, %v2332_v3  ;;  %v2312_v3 = vld [vmem:[%s3178_s0 + $0x78] sm:$0xff]  ;;  %v2378_v9 = vld [vmem:[%s3178_s0 + $0x288] sm:$0xff] }
  0xda   :  { %2266 = vmatmul.msk.bf16.gmra.mxu2 %vm638_vm2, %v2354_v7  ;;  %2288 = vmatmul.msk.bf16.gmra.mxu3 %vm638_vm2, %v2376_v8  ;;  %v2356_v8 = vld [vmem:[%s3178_s0 + $0x1d8] sm:$0xff] }
  0xdb   :  { %v1681_v15 = vadd.f32 %v2570_v55, %v1429_v14 }
  0xdd   :  { %v1725_v17 = vmax.f32 %v1681_v15, 0.0  ;;  %v1164_v18 = vpop.f32.mrf.mxu2  ;;  %v1274_v19 = vpop.f32.mrf.mxu3 }
  0xde   :  { %v1433_v20 = vsel %vm1359_vm3, %v1164_v18, -inf  ;;  %v1435_v21 = vsel %vm1359_vm3, %v1274_v19, -inf  ;;  %v946_v22 = vpop.f32.mrf.mxu0  ;;  %v1056_v23 = vpop.f32.mrf.mxu1 }
  0xdf   :  { %v1769_v24 = vpack.c.bf16 %v1725_v17, %v1725_v17  ;;  %v1434_v25 = vmax.f32 %v1432_v16, %v1433_v20  ;;  %v1437_v27 = vsel %vm1359_vm3, %v946_v22, -inf  ;;  %v1438_v28 = vsel %vm1359_vm3, %v1056_v23, -inf }
  0xe0   :  { %v1439_v31 = vmax.f32 %v1437_v27, %v1438_v28 }
  0xe1   :  { %1814 = vst.msk [vmem:[%s3180_s3 + $0x24] sm:$0xf] %vm1804_vm4, %v1769_v24  ;;  %v1436_v26 = vmax.f32 %v1434_v25, %v1435_v21 }
  0xe3   :  { %v1682_v29 = vadd.f32 %v2570_v55, %v1436_v26 }
  0xe5   :  { %v1726_v30 = vmax.f32 %v1682_v29, 0.0  ;;  %v1166_v32 = vpop.f32.mrf.mxu2  ;;  %v1276_v33 = vpop.f32.mrf.mxu3 }
  0xe6   :  { %v1440_v36 = vsel %vm1359_vm3, %v1166_v32, -inf  ;;  %v949_v37 = vpop.f32.mrf.mxu0  ;;  %v1059_v38 = vpop.f32.mrf.mxu1  ;;  %v1442_v43 = vsel %vm1359_vm3, %v1276_v33, -inf }
  0xe7   :  { %v1770_v41 = vpack.c.bf16 %v1726_v30, %v1726_v30  ;;  %v1441_v42 = vmax.f32 %v1439_v31, %v1440_v36  ;;  %v1444_v44 = vsel %vm1359_vm3, %v949_v37, -inf  ;;  %v1445_v45 = vsel %vm1359_vm3, %v1059_v38, -inf  ;;  %v2335_v36 = vld [vmem:[%s3178_s0 + $0x130] sm:$0xff] }
  0xe8   :  { %v1446_v48 = vmax.f32 %v1444_v44, %v1445_v45 }
  0xe9   :  { %1815 = vst.msk [vmem:[%s3180_s3 + $0x28] sm:$0xf] %vm1804_vm4, %v1770_v41  ;;  %v1443_v46 = vmax.f32 %v1441_v42, %v1442_v43  ;;  %2223 = vmatmul.msk.bf16.gmra.mxu0 %vm638_vm2, %v2311_v34  ;;  %2245 = vmatmul.msk.bf16.gmra.mxu1 %vm638_vm2, %v2333_v35  ;;  %v2313_v35 = vld [vmem:[%s3178_s0 + $0x80] sm:$0xff]  ;;  %v2379_v41 = vld [vmem:[%s3178_s0 + $0x290] sm:$0xff] }
  0xea   :  { %2267 = vmatmul.msk.bf16.gmra.mxu2 %vm638_vm2, %v2355_v39  ;;  %2289 = vmatmul.msk.bf16.gmra.mxu3 %vm638_vm2, %v2377_v40  ;;  %v2357_v40 = vld [vmem:[%s3178_s0 + $0x1e0] sm:$0xff] }
  0xeb   :  { %v1683_v47 = vadd.f32 %v2570_v55, %v1443_v46 }
  0xed   :  { %v1727_v49 = vmax.f32 %v1683_v47, 0.0  ;;  %v1169_v50 = vpop.f32.mrf.mxu2  ;;  %v1279_v51 = vpop.f32.mrf.mxu3 }
  0xee   :  { %v1447_v52 = vsel %vm1359_vm3, %v1169_v50, -inf  ;;  %v1449_v53 = vsel %vm1359_vm3, %v1279_v51, -inf  ;;  %v951_v54 = vpop.f32.mrf.mxu0  ;;  %v1061_v56 = vpop.f32.mrf.mxu1 }
  0xef   :  { %v1771_v57 = vpack.c.bf16 %v1727_v49, %v1727_v49  ;;  %v1448_v58 = vmax.f32 %v1446_v48, %v1447_v52  ;;  %v1451_v60 = vsel %vm1359_vm3, %v951_v54, -inf  ;;  %v1452_v61 = vsel %vm1359_vm3, %v1061_v56, -inf }
  0xf0   :  { %v1453_v0 = vmax.f32 %v1451_v60, %v1452_v61 }
  0xf1   :  { %1816 = vst.msk [vmem:[%s3180_s3 + $0x2c] sm:$0xf] %vm1804_vm4, %v1771_v57  ;;  %v1450_v59 = vmax.f32 %v1448_v58, %v1449_v53 }
  0xf3   :  { %v1684_v62 = vadd.f32 %v2570_v55, %v1450_v59 }
  0xf5   :  { %v1728_v63 = vmax.f32 %v1684_v62, 0.0  ;;  %v1171_v1 = vpop.f32.mrf.mxu2  ;;  %v1281_v2 = vpop.f32.mrf.mxu3 }
  0xf6   :  { %v1454_v5 = vsel %vm1359_vm3, %v1171_v1, -inf  ;;  %v954_v6 = vpop.f32.mrf.mxu0  ;;  %v1064_v7 = vpop.f32.mrf.mxu1  ;;  %v1456_v12 = vsel %vm1359_vm3, %v1281_v2, -inf }
  0xf7   :  { %v1772_v10 = vpack.c.bf16 %v1728_v63, %v1728_v63  ;;  %v1455_v11 = vmax.f32 %v1453_v0, %v1454_v5  ;;  %v1458_v13 = vsel %vm1359_vm3, %v954_v6, -inf  ;;  %v1459_v14 = vsel %vm1359_vm3, %v1064_v7, -inf  ;;  %v2336_v5 = vld [vmem:[%s3178_s0 + $0x138] sm:$0xff] }
  0xf8   :  { %v1460_v17 = vmax.f32 %v1458_v13, %v1459_v14 }
  0xf9   :  { %1817 = vst.msk [vmem:[%s3180_s3 + $0x30] sm:$0xf] %vm1804_vm4, %v1772_v10  ;;  %v1457_v15 = vmax.f32 %v1455_v11, %v1456_v12  ;;  %2224 = vmatmul.msk.bf16.gmra.mxu0 %vm638_vm2, %v2312_v3  ;;  %2246 = vmatmul.msk.bf16.gmra.mxu1 %vm638_vm2, %v2334_v4  ;;  %v2314_v4 = vld [vmem:[%s3178_s0 + $0x88] sm:$0xff]  ;;  %v2380_v10 = vld [vmem:[%s3178_s0 + $0x298] sm:$0xff] }
  0xfa   :  { %2268 = vmatmul.msk.bf16.gmra.mxu2 %vm638_vm2, %v2356_v8  ;;  %2290 = vmatmul.msk.bf16.gmra.mxu3 %vm638_vm2, %v2378_v9  ;;  %v2358_v9 = vld [vmem:[%s3178_s0 + $0x1e8] sm:$0xff] }
  0xfb   :  { %v1685_v16 = vadd.f32 %v2570_v55, %v1457_v15 }
  0xfd   :  { %v1729_v18 = vmax.f32 %v1685_v16, 0.0  ;;  %v1174_v19 = vpop.f32.mrf.mxu2  ;;  %v1284_v20 = vpop.f32.mrf.mxu3 }
  0xfe   :  { %v1461_v21 = vsel %vm1359_vm3, %v1174_v19, -inf  ;;  %v1463_v22 = vsel %vm1359_vm3, %v1284_v20, -inf  ;;  %v956_v23 = vpop.f32.mrf.mxu0  ;;  %v1066_v24 = vpop.f32.mrf.mxu1 }
  0xff   :  { %v1773_v25 = vpack.c.bf16 %v1729_v18, %v1729_v18  ;;  %v1462_v26 = vmax.f32 %v1460_v17, %v1461_v21  ;;  %v1465_v28 = vsel %vm1359_vm3, %v956_v23, -inf  ;;  %v1466_v29 = vsel %vm1359_vm3, %v1066_v24, -inf }
 0x100   :  { %v1467_v32 = vmax.f32 %v1465_v28, %v1466_v29 }
 0x101   :  { %1818 = vst.msk [vmem:[%s3180_s3 + $0x34] sm:$0xf] %vm1804_vm4, %v1773_v25  ;;  %v1464_v27 = vmax.f32 %v1462_v26, %v1463_v22 }
 0x103   :  { %v1686_v30 = vadd.f32 %v2570_v55, %v1464_v27 }
 0x105   :  { %v1730_v31 = vmax.f32 %v1686_v30, 0.0  ;;  %v1176_v33 = vpop.f32.mrf.mxu2  ;;  %v1286_v34 = vpop.f32.mrf.mxu3 }
 0x106   :  { %v1468_v37 = vsel %vm1359_vm3, %v1176_v33, -inf  ;;  %v959_v38 = vpop.f32.mrf.mxu0  ;;  %v1069_v39 = vpop.f32.mrf.mxu1  ;;  %v1470_v44 = vsel %vm1359_vm3, %v1286_v34, -inf }
 0x107   :  { %v1774_v42 = vpack.c.bf16 %v1730_v31, %v1730_v31  ;;  %v1469_v43 = vmax.f32 %v1467_v32, %v1468_v37  ;;  %v1472_v45 = vsel %vm1359_vm3, %v959_v38, -inf  ;;  %v1473_v46 = vsel %vm1359_vm3, %v1069_v39, -inf  ;;  %v2337_v37 = vld [vmem:[%s3178_s0 + $0x140] sm:$0xff] }
 0x108   :  { %v1474_v49 = vmax.f32 %v1472_v45, %v1473_v46 }
 0x109   :  { %1819 = vst.msk [vmem:[%s3180_s3 + $0x38] sm:$0xf] %vm1804_vm4, %v1774_v42  ;;  %v1471_v47 = vmax.f32 %v1469_v43, %v1470_v44  ;;  %2225 = vmatmul.msk.bf16.gmra.mxu0 %vm638_vm2, %v2313_v35  ;;  %2247 = vmatmul.msk.bf16.gmra.mxu1 %vm638_vm2, %v2335_v36  ;;  %v2315_v36 = vld [vmem:[%s3178_s0 + $0x90] sm:$0xff]  ;;  %v2381_v42 = vld [vmem:[%s3178_s0 + $0x2a0] sm:$0xff] }
 0x10a   :  { %2269 = vmatmul.msk.bf16.gmra.mxu2 %vm638_vm2, %v2357_v40  ;;  %2291 = vmatmul.msk.bf16.gmra.mxu3 %vm638_vm2, %v2379_v41  ;;  %v2359_v41 = vld [vmem:[%s3178_s0 + $0x1f0] sm:$0xff] }
 0x10b   :  { %v1687_v48 = vadd.f32 %v2570_v55, %v1471_v47 }
 0x10d   :  { %v1731_v50 = vmax.f32 %v1687_v48, 0.0  ;;  %v1179_v51 = vpop.f32.mrf.mxu2  ;;  %v1289_v52 = vpop.f32.mrf.mxu3 }
 0x10e   :  { %v1475_v53 = vsel %vm1359_vm3, %v1179_v51, -inf  ;;  %v1477_v54 = vsel %vm1359_vm3, %v1289_v52, -inf  ;;  %v961_v56 = vpop.f32.mrf.mxu0  ;;  %v1071_v57 = vpop.f32.mrf.mxu1 }
 0x10f   :  { %v1775_v58 = vpack.c.bf16 %v1731_v50, %v1731_v50  ;;  %v1476_v59 = vmax.f32 %v1474_v49, %v1475_v53  ;;  %v1479_v61 = vsel %vm1359_vm3, %v961_v56, -inf  ;;  %v1480_v62 = vsel %vm1359_vm3, %v1071_v57, -inf }
 0x110   :  { %v1481_v1 = vmax.f32 %v1479_v61, %v1480_v62 }
 0x111   :  { %1820 = vst.msk [vmem:[%s3180_s3 + $0x3c] sm:$0xf] %vm1804_vm4, %v1775_v58  ;;  %v1478_v60 = vmax.f32 %v1476_v59, %v1477_v54 }
 0x113   :  { %v1688_v63 = vadd.f32 %v2570_v55, %v1478_v60 }
 0x115   :  { %v1732_v0 = vmax.f32 %v1688_v63, 0.0  ;;  %v1181_v2 = vpop.f32.mrf.mxu2  ;;  %v1291_v3 = vpop.f32.mrf.mxu3 }
 0x116   :  { %v1482_v6 = vsel %vm1359_vm3, %v1181_v2, -inf  ;;  %v964_v7 = vpop.f32.mrf.mxu0  ;;  %v1074_v8 = vpop.f32.mrf.mxu1  ;;  %v1484_v13 = vsel %vm1359_vm3, %v1291_v3, -inf }
 0x117   :  { %v1776_v11 = vpack.c.bf16 %v1732_v0, %v1732_v0  ;;  %v1483_v12 = vmax.f32 %v1481_v1, %v1482_v6  ;;  %v1486_v14 = vsel %vm1359_vm3, %v964_v7, -inf  ;;  %v1487_v15 = vsel %vm1359_vm3, %v1074_v8, -inf  ;;  %v2338_v6 = vld [vmem:[%s3178_s0 + $0x148] sm:$0xff] }
 0x118   :  { %v1488_v18 = vmax.f32 %v1486_v14, %v1487_v15 }
 0x119   :  { %1821 = vst.msk [vmem:[%s3180_s3 + $0x40] sm:$0xf] %vm1804_vm4, %v1776_v11  ;;  %v1485_v16 = vmax.f32 %v1483_v12, %v1484_v13  ;;  %2226 = vmatmul.msk.bf16.gmra.mxu0 %vm638_vm2, %v2314_v4  ;;  %2248 = vmatmul.msk.bf16.gmra.mxu1 %vm638_vm2, %v2336_v5  ;;  %v2316_v5 = vld [vmem:[%s3178_s0 + $0x98] sm:$0xff]  ;;  %v2382_v11 = vld [vmem:[%s3178_s0 + $0x2a8] sm:$0xff] }
 0x11a   :  { %2270 = vmatmul.msk.bf16.gmra.mxu2 %vm638_vm2, %v2358_v9  ;;  %2292 = vmatmul.msk.bf16.gmra.mxu3 %vm638_vm2, %v2380_v10  ;;  %v2360_v10 = vld [vmem:[%s3178_s0 + $0x1f8] sm:$0xff] }
 0x11b   :  { %v1689_v17 = vadd.f32 %v2570_v55, %v1485_v16 }
 0x11d   :  { %v1733_v19 = vmax.f32 %v1689_v17, 0.0  ;;  %v1184_v20 = vpop.f32.mrf.mxu2  ;;  %v1294_v21 = vpop.f32.mrf.mxu3 }
 0x11e   :  { %v1489_v22 = vsel %vm1359_vm3, %v1184_v20, -inf  ;;  %v1491_v23 = vsel %vm1359_vm3, %v1294_v21, -inf  ;;  %v966_v24 = vpop.f32.mrf.mxu0  ;;  %v1076_v25 = vpop.f32.mrf.mxu1 }
 0x11f   :  { %v1777_v26 = vpack.c.bf16 %v1733_v19, %v1733_v19  ;;  %v1490_v27 = vmax.f32 %v1488_v18, %v1489_v22  ;;  %v1493_v29 = vsel %vm1359_vm3, %v966_v24, -inf  ;;  %v1494_v30 = vsel %vm1359_vm3, %v1076_v25, -inf }
 0x120   :  { %v1495_v33 = vmax.f32 %v1493_v29, %v1494_v30 }
 0x121   :  { %1822 = vst.msk [vmem:[%s3180_s3 + $0x44] sm:$0xf] %vm1804_vm4, %v1777_v26  ;;  %v1492_v28 = vmax.f32 %v1490_v27, %v1491_v23 }
 0x123   :  { %v1690_v31 = vadd.f32 %v2570_v55, %v1492_v28 }
 0x125   :  { %v1734_v32 = vmax.f32 %v1690_v31, 0.0  ;;  %v1186_v34 = vpop.f32.mrf.mxu2  ;;  %v1296_v35 = vpop.f32.mrf.mxu3 }
 0x126   :  { %v1496_v38 = vsel %vm1359_vm3, %v1186_v34, -inf  ;;  %v969_v39 = vpop.f32.mrf.mxu0  ;;  %v1079_v40 = vpop.f32.mrf.mxu1  ;;  %v1498_v45 = vsel %vm1359_vm3, %v1296_v35, -inf }
 0x127   :  { %v1778_v43 = vpack.c.bf16 %v1734_v32, %v1734_v32  ;;  %v1497_v44 = vmax.f32 %v1495_v33, %v1496_v38  ;;  %v1500_v46 = vsel %vm1359_vm3, %v969_v39, -inf  ;;  %v1501_v47 = vsel %vm1359_vm3, %v1079_v40, -inf  ;;  %v2339_v38 = vld [vmem:[%s3178_s0 + $0x150] sm:$0xff] }
 0x128   :  { %v1502_v50 = vmax.f32 %v1500_v46, %v1501_v47 }
 0x129   :  { %1823 = vst.msk [vmem:[%s3180_s3 + $0x48] sm:$0xf] %vm1804_vm4, %v1778_v43  ;;  %v1499_v48 = vmax.f32 %v1497_v44, %v1498_v45  ;;  %2227 = vmatmul.msk.bf16.gmra.mxu0 %vm638_vm2, %v2315_v36  ;;  %2249 = vmatmul.msk.bf16.gmra.mxu1 %vm638_vm2, %v2337_v37  ;;  %v2317_v37 = vld [vmem:[%s3178_s0 + $0xa0] sm:$0xff]  ;;  %v2383_v43 = vld [vmem:[%s3178_s0 + $0x2b0] sm:$0xff] }
 0x12a   :  { %2271 = vmatmul.msk.bf16.gmra.mxu2 %vm638_vm2, %v2359_v41  ;;  %2293 = vmatmul.msk.bf16.gmra.mxu3 %vm638_vm2, %v2381_v42  ;;  %v2361_v42 = vld [vmem:[%s3178_s0 + $0x200] sm:$0xff] }
 0x12b   :  { %v1691_v49 = vadd.f32 %v2570_v55, %v1499_v48 }
 0x12d   :  { %v1735_v51 = vmax.f32 %v1691_v49, 0.0  ;;  %v1189_v52 = vpop.f32.mrf.mxu2  ;;  %v1299_v53 = vpop.f32.mrf.mxu3 }
 0x12e   :  { %v1503_v54 = vsel %vm1359_vm3, %v1189_v52, -inf  ;;  %v1505_v56 = vsel %vm1359_vm3, %v1299_v53, -inf  ;;  %v971_v57 = vpop.f32.mrf.mxu0  ;;  %v1081_v58 = vpop.f32.mrf.mxu1 }
 0x12f   :  { %v1779_v59 = vpack.c.bf16 %v1735_v51, %v1735_v51  ;;  %v1504_v60 = vmax.f32 %v1502_v50, %v1503_v54  ;;  %v1507_v62 = vsel %vm1359_vm3, %v971_v57, -inf  ;;  %v1508_v63 = vsel %vm1359_vm3, %v1081_v58, -inf }
 0x130   :  { %v1509_v2 = vmax.f32 %v1507_v62, %v1508_v63 }
 0x131   :  { %1824 = vst.msk [vmem:[%s3180_s3 + $0x4c] sm:$0xf] %vm1804_vm4, %v1779_v59  ;;  %v1506_v61 = vmax.f32 %v1504_v60, %v1505_v56 }
 0x133   :  { %v1692_v0 = vadd.f32 %v2570_v55, %v1506_v61 }
 0x135   :  { %v1736_v1 = vmax.f32 %v1692_v0, 0.0  ;;  %v1191_v3 = vpop.f32.mrf.mxu2  ;;  %v1301_v4 = vpop.f32.mrf.mxu3 }
 0x136   :  { %v1510_v7 = vsel %vm1359_vm3, %v1191_v3, -inf  ;;  %v974_v8 = vpop.f32.mrf.mxu0  ;;  %v1084_v9 = vpop.f32.mrf.mxu1  ;;  %v1512_v14 = vsel %vm1359_vm3, %v1301_v4, -inf }
 0x137   :  { %v1780_v12 = vpack.c.bf16 %v1736_v1, %v1736_v1  ;;  %v1511_v13 = vmax.f32 %v1509_v2, %v1510_v7  ;;  %v1514_v15 = vsel %vm1359_vm3, %v974_v8, -inf  ;;  %v1515_v16 = vsel %vm1359_vm3, %v1084_v9, -inf  ;;  %v2340_v7 = vld [vmem:[%s3178_s0 + $0x158] sm:$0xff] }
 0x138   :  { %v1516_v19 = vmax.f32 %v1514_v15, %v1515_v16 }
 0x139   :  { %1825 = vst.msk [vmem:[%s3180_s3 + $0x50] sm:$0xf] %vm1804_vm4, %v1780_v12  ;;  %v1513_v17 = vmax.f32 %v1511_v13, %v1512_v14  ;;  %2228 = vmatmul.msk.bf16.gmra.mxu0 %vm638_vm2, %v2316_v5  ;;  %2250 = vmatmul.msk.bf16.gmra.mxu1 %vm638_vm2, %v2338_v6  ;;  %v2318_v6 = vld [vmem:[%s3178_s0 + $0xa8] sm:$0xff]  ;;  %v2384_v12 = vld [vmem:[%s3178_s0 + $0x2b8] sm:$0xff] }
 0x13a   :  { %2272 = vmatmul.msk.bf16.gmra.mxu2 %vm638_vm2, %v2360_v10  ;;  %2294 = vmatmul.msk.bf16.gmra.mxu3 %vm638_vm2, %v2382_v11  ;;  %v2362_v11 = vld [vmem:[%s3178_s0 + $0x208] sm:$0xff] }
 0x13b   :  { %v1693_v18 = vadd.f32 %v2570_v55, %v1513_v17 }
 0x13d   :  { %v1737_v20 = vmax.f32 %v1693_v18, 0.0  ;;  %v1194_v21 = vpop.f32.mrf.mxu2  ;;  %v1304_v22 = vpop.f32.mrf.mxu3 }
 0x13e   :  { %v1517_v23 = vsel %vm1359_vm3, %v1194_v21, -inf  ;;  %v1519_v24 = vsel %vm1359_vm3, %v1304_v22, -inf  ;;  %v976_v25 = vpop.f32.mrf.mxu0  ;;  %v1086_v26 = vpop.f32.mrf.mxu1 }
 0x13f   :  { %v1781_v27 = vpack.c.bf16 %v1737_v20, %v1737_v20  ;;  %v1518_v28 = vmax.f32 %v1516_v19, %v1517_v23  ;;  %v1521_v30 = vsel %vm1359_vm3, %v976_v25, -inf  ;;  %v1522_v31 = vsel %vm1359_vm3, %v1086_v26, -inf }
 0x140   :  { %v1523_v34 = vmax.f32 %v1521_v30, %v1522_v31 }
 0x141   :  { %1826 = vst.msk [vmem:[%s3180_s3 + $0x54] sm:$0xf] %vm1804_vm4, %v1781_v27  ;;  %v1520_v29 = vmax.f32 %v1518_v28, %v1519_v24 }
 0x143   :  { %v1694_v32 = vadd.f32 %v2570_v55, %v1520_v29 }
 0x145   :  { %v1738_v33 = vmax.f32 %v1694_v32, 0.0  ;;  %v1196_v35 = vpop.f32.mrf.mxu2  ;;  %v1306_v36 = vpop.f32.mrf.mxu3 }
 0x146   :  { %v1524_v39 = vsel %vm1359_vm3, %v1196_v35, -inf  ;;  %v979_v40 = vpop.f32.mrf.mxu0  ;;  %v1089_v41 = vpop.f32.mrf.mxu1  ;;  %v1526_v46 = vsel %vm1359_vm3, %v1306_v36, -inf }
 0x147   :  { %v1782_v44 = vpack.c.bf16 %v1738_v33, %v1738_v33  ;;  %v1525_v45 = vmax.f32 %v1523_v34, %v1524_v39  ;;  %v1528_v47 = vsel %vm1359_vm3, %v979_v40, -inf  ;;  %v1529_v48 = vsel %vm1359_vm3, %v1089_v41, -inf }
 0x148   :  { %v1530_v51 = vmax.f32 %v1528_v47, %v1529_v48 }
 0x149   :  { %1827 = vst.msk [vmem:[%s3180_s3 + $0x58] sm:$0xf] %vm1804_vm4, %v1782_v44  ;;  %v1527_v49 = vmax.f32 %v1525_v45, %v1526_v46  ;;  %2229 = vmatmul.msk.bf16.gmra.mxu0 %vm638_vm2, %v2317_v37  ;;  %2251 = vmatmul.msk.bf16.gmra.mxu1 %vm638_vm2, %v2339_v38  ;;  %v3028_v46 = vld [vmem:[%s3179_s2] ss:$0 sm:$0xff] }
 0x14a   :  { %2273 = vmatmul.msk.bf16.gmra.mxu2 %vm638_vm2, %v2361_v42  ;;  %2295 = vmatmul.msk.bf16.gmra.mxu3 %vm638_vm2, %v2383_v43 }
 0x14b   :  { %v1695_v50 = vadd.f32 %v2570_v55, %v1527_v49 }
 0x14d   :  { %v1739_v52 = vmax.f32 %v1695_v50, 0.0  ;;  %v1199_v53 = vpop.f32.mrf.mxu2  ;;  %v1309_v54 = vpop.f32.mrf.mxu3 }
 0x14e   :  { %v1531_v56 = vsel %vm1359_vm3, %v1199_v53, -inf  ;;  %v1533_v57 = vsel %vm1359_vm3, %v1309_v54, -inf  ;;  %v981_v58 = vpop.f32.mrf.mxu0  ;;  %v1091_v59 = vpop.f32.mrf.mxu1 }
 0x14f   :  { %v1783_v60 = vpack.c.bf16 %v1739_v52, %v1739_v52  ;;  %v1532_v61 = vmax.f32 %v1530_v51, %v1531_v56  ;;  %v1535_v63 = vsel %vm1359_vm3, %v981_v58, -inf  ;;  %v1536_v0 = vsel %vm1359_vm3, %v1091_v59, -inf }
 0x150   :  { %v1537_v3 = vmax.f32 %v1535_v63, %v1536_v0 }
 0x151   :  { %1828 = vst.msk [vmem:[%s3180_s3 + $0x5c] sm:$0xf] %vm1804_vm4, %v1783_v60  ;;  %v1534_v62 = vmax.f32 %v1532_v61, %v1533_v57 }
 0x153   :  { %v1696_v1 = vadd.f32 %v2570_v55, %v1534_v62 }
 0x155   :  { %v1740_v2 = vmax.f32 %v1696_v1, 0.0  ;;  %v1201_v4 = vpop.f32.mrf.mxu2  ;;  %v1311_v5 = vpop.f32.mrf.mxu3 }
 0x156   :  { %v1538_v8 = vsel %vm1359_vm3, %v1201_v4, -inf  ;;  %v984_v9 = vpop.f32.mrf.mxu0  ;;  %v1094_v10 = vpop.f32.mrf.mxu1  ;;  %v1540_v15 = vsel %vm1359_vm3, %v1311_v5, -inf }
 0x157   :  { %v1784_v13 = vpack.c.bf16 %v1740_v2, %v1740_v2  ;;  %v1539_v14 = vmax.f32 %v1537_v3, %v1538_v8  ;;  %v1542_v16 = vsel %vm1359_vm3, %v984_v9, -inf  ;;  %v1543_v17 = vsel %vm1359_vm3, %v1094_v10, -inf }
 0x158   :  { %v1544_v20 = vmax.f32 %v1542_v16, %v1543_v17 }
 0x159   :  { %1829 = vst.msk [vmem:[%s3180_s3 + $0x60] sm:$0xf] %vm1804_vm4, %v1784_v13  ;;  %v1541_v18 = vmax.f32 %v1539_v14, %v1540_v15  ;;  %2230 = vmatmul.msk.bf16.gmra.mxu0 %vm638_vm2, %v2318_v6  ;;  %2252 = vmatmul.msk.bf16.gmra.mxu1 %vm638_vm2, %v2340_v7 }
 0x15a   :  { %2274 = vmatmul.msk.bf16.gmra.mxu2 %vm638_vm2, %v2362_v11  ;;  %2296 = vmatmul.msk.bf16.gmra.mxu3 %vm638_vm2, %v2384_v12 }
 0x15b   :  { %v1697_v19 = vadd.f32 %v2570_v55, %v1541_v18 }
 0x15d   :  { %v1741_v21 = vmax.f32 %v1697_v19, 0.0  ;;  %v1204_v22 = vpop.f32.mrf.mxu2  ;;  %v1314_v23 = vpop.f32.mrf.mxu3 }
 0x15e   :  { %v1545_v24 = vsel %vm1359_vm3, %v1204_v22, -inf  ;;  %v1547_v25 = vsel %vm1359_vm3, %v1314_v23, -inf  ;;  %v986_v26 = vpop.f32.mrf.mxu0  ;;  %v1096_v27 = vpop.f32.mrf.mxu1 }
 0x15f   :  { %v1785_v28 = vpack.c.bf16 %v1741_v21, %v1741_v21  ;;  %v1546_v29 = vmax.f32 %v1544_v20, %v1545_v24  ;;  %v1549_v31 = vsel %vm1359_vm3, %v986_v26, -inf  ;;  %v1550_v32 = vsel %vm1359_vm3, %v1096_v27, -inf }
 0x160   :  { %v1551_v35 = vmax.f32 %v1549_v31, %v1550_v32 }
 0x161   :  { %1830 = vst.msk [vmem:[%s3180_s3 + $0x64] sm:$0xf] %vm1804_vm4, %v1785_v28  ;;  %v1548_v30 = vmax.f32 %v1546_v29, %v1547_v25 }
 0x163   :  { %v1698_v33 = vadd.f32 %v2570_v55, %v1548_v30 }
 0x165   :  { %v1742_v34 = vmax.f32 %v1698_v33, 0.0  ;;  %v1206_v36 = vpop.f32.mrf.mxu2  ;;  %v1316_v37 = vpop.f32.mrf.mxu3 }
 0x166   :  { %v1552_v38 = vsel %vm1359_vm3, %v1206_v36, -inf  ;;  %v989_v39 = vpop.f32.mrf.mxu0  ;;  %v1099_v40 = vpop.f32.mrf.mxu1  ;;  %v1554_v43 = vsel %vm1359_vm3, %v1316_v37, -inf }
 0x167   :  { %v1786_v41 = vpack.c.bf16 %v1742_v34, %v1742_v34  ;;  %v1553_v42 = vmax.f32 %v1551_v35, %v1552_v38  ;;  %v1556_v44 = vsel %vm1359_vm3, %v989_v39, -inf  ;;  %v1557_v45 = vsel %vm1359_vm3, %v1099_v40, -inf }
 0x168   :  { %v1558_v48 = vmax.f32 %v1556_v44, %v1557_v45 }
 0x169   :  { %1831 = vst.msk [vmem:[%s3180_s3 + $0x68] sm:$0xf] %vm1804_vm4, %v1786_v41  ;;  %v1555_v55 = vmax.f32 %v1553_v42, %v1554_v43 }
 0x16b   :  { %v1699_v47 = vadd.f32 %v3028_v46, %v1555_v55 }
 0x16d   :  { %v1743_v49 = vmax.f32 %v1699_v47, 0.0  ;;  %v1209_v50 = vpop.f32.mrf.mxu2  ;;  %v1319_v51 = vpop.f32.mrf.mxu3 }
 0x16e   :  { %v1559_v52 = vsel %vm1359_vm3, %v1209_v50, -inf  ;;  %v1561_v53 = vsel %vm1359_vm3, %v1319_v51, -inf  ;;  %v991_v54 = vpop.f32.mrf.mxu0  ;;  %v1101_v56 = vpop.f32.mrf.mxu1 }
 0x16f   :  { %v1787_v57 = vpack.c.bf16 %v1743_v49, %v1743_v49  ;;  %v1560_v58 = vmax.f32 %v1558_v48, %v1559_v52  ;;  %v1563_v60 = vsel %vm1359_vm3, %v991_v54, -inf  ;;  %v1564_v61 = vsel %vm1359_vm3, %v1101_v56, -inf }
 0x170   :  { %v1565_v0 = vmax.f32 %v1563_v60, %v1564_v61 }
 0x171   :  { %1832 = vst.msk [vmem:[%s3180_s3 + $0x6c] sm:$0xf] %vm1804_vm4, %v1787_v57  ;;  %v1562_v59 = vmax.f32 %v1560_v58, %v1561_v53 }
 0x173   :  { %v1700_v62 = vadd.f32 %v3028_v46, %v1562_v59 }
 0x175   :  { %v1744_v63 = vmax.f32 %v1700_v62, 0.0  ;;  %v1211_v1 = vpop.f32.mrf.mxu2  ;;  %v1321_v2 = vpop.f32.mrf.mxu3 }
 0x176   :  { %v1566_v3 = vsel %vm1359_vm3, %v1211_v1, -inf  ;;  %v994_v4 = vpop.f32.mrf.mxu0  ;;  %v1104_v5 = vpop.f32.mrf.mxu1  ;;  %v1568_v8 = vsel %vm1359_vm3, %v1321_v2, -inf }
 0x177   :  { %v1788_v6 = vpack.c.bf16 %v1744_v63, %v1744_v63  ;;  %v1567_v7 = vmax.f32 %v1565_v0, %v1566_v3  ;;  %v1570_v9 = vsel %vm1359_vm3, %v994_v4, -inf  ;;  %v1571_v10 = vsel %vm1359_vm3, %v1104_v5, -inf }
 0x178   :  { %v1572_v13 = vmax.f32 %v1570_v9, %v1571_v10 }
 0x179   :  { %1833 = vst.msk [vmem:[%s3180_s3 + $0x70] sm:$0xf] %vm1804_vm4, %v1788_v6  ;;  %v1569_v11 = vmax.f32 %v1567_v7, %v1568_v8 }
 0x17b   :  { %v1701_v12 = vadd.f32 %v3028_v46, %v1569_v11 }
 0x17d   :  { %v1745_v14 = vmax.f32 %v1701_v12, 0.0  ;;  %v1214_v15 = vpop.f32.mrf.mxu2  ;;  %v1324_v16 = vpop.f32.mrf.mxu3 }
 0x17e   :  { %v1573_v17 = vsel %vm1359_vm3, %v1214_v15, -inf  ;;  %v1575_v18 = vsel %vm1359_vm3, %v1324_v16, -inf  ;;  %v996_v19 = vpop.f32.mrf.mxu0  ;;  %v1106_v20 = vpop.f32.mrf.mxu1 }
 0x17f   :  { %v1789_v21 = vpack.c.bf16 %v1745_v14, %v1745_v14  ;;  %v1574_v22 = vmax.f32 %v1572_v13, %v1573_v17  ;;  %v1577_v24 = vsel %vm1359_vm3, %v996_v19, -inf  ;;  %v1578_v25 = vsel %vm1359_vm3, %v1106_v20, -inf }
 0x180   :  { %v1579_v28 = vmax.f32 %v1577_v24, %v1578_v25 }
 0x181   :  { %1834 = vst.msk [vmem:[%s3180_s3 + $0x74] sm:$0xf] %vm1804_vm4, %v1789_v21  ;;  %v1576_v23 = vmax.f32 %v1574_v22, %v1575_v18 }
 0x183   :  { %v1702_v26 = vadd.f32 %v3028_v46, %v1576_v23 }
 0x185   :  { %v1746_v27 = vmax.f32 %v1702_v26, 0.0  ;;  %v1216_v29 = vpop.f32.mrf.mxu2  ;;  %v1326_v30 = vpop.f32.mrf.mxu3 }
 0x186   :  { %v1580_v31 = vsel %vm1359_vm3, %v1216_v29, -inf  ;;  %v999_v32 = vpop.f32.mrf.mxu0  ;;  %v1109_v33 = vpop.f32.mrf.mxu1  ;;  %v1582_v36 = vsel %vm1359_vm3, %v1326_v30, -inf }
 0x187   :  { %v1790_v34 = vpack.c.bf16 %v1746_v27, %v1746_v27  ;;  %v1581_v35 = vmax.f32 %v1579_v28, %v1580_v31  ;;  %v1584_v37 = vsel %vm1359_vm3, %v999_v32, -inf  ;;  %v1585_v38 = vsel %vm1359_vm3, %v1109_v33, -inf }
 0x188   :  { %v1586_v41 = vmax.f32 %v1584_v37, %v1585_v38 }
 0x189   :  { %1835 = vst.msk [vmem:[%s3180_s3 + $0x78] sm:$0xf] %vm1804_vm4, %v1790_v34  ;;  %v1583_v39 = vmax.f32 %v1581_v35, %v1582_v36 }
 0x18b   :  { %v1703_v40 = vadd.f32 %v3028_v46, %v1583_v39 }
 0x18d   :  { %v1747_v42 = vmax.f32 %v1703_v40, 0.0  ;;  %v1219_v43 = vpop.f32.mrf.mxu2  ;;  %v1329_v44 = vpop.f32.mrf.mxu3 }
 0x18e   :  { %v1587_v45 = vsel %vm1359_vm3, %v1219_v43, -inf  ;;  %v1589_v55 = vsel %vm1359_vm3, %v1329_v44, -inf  ;;  %v1001_v47 = vpop.f32.mrf.mxu0  ;;  %v1111_v48 = vpop.f32.mrf.mxu1 }
 0x18f   :  { %v1791_v49 = vpack.c.bf16 %v1747_v42, %v1747_v42  ;;  %v1588_v50 = vmax.f32 %v1586_v41, %v1587_v45  ;;  %v1591_v52 = vsel %vm1359_vm3, %v1001_v47, -inf  ;;  %v1592_v53 = vsel %vm1359_vm3, %v1111_v48, -inf }
 0x190   :  { %v1593_v57 = vmax.f32 %v1591_v52, %v1592_v53 }
 0x191   :  { %1836 = vst.msk [vmem:[%s3180_s3 + $0x7c] sm:$0xf] %vm1804_vm4, %v1791_v49  ;;  %v1590_v51 = vmax.f32 %v1588_v50, %v1589_v55 }
 0x193   :  { %v1704_v54 = vadd.f32 %v3028_v46, %v1590_v51 }
 0x195   :  { %v1748_v56 = vmax.f32 %v1704_v54, 0.0  ;;  %v1221_v58 = vpop.f32.mrf.mxu2  ;;  %v1331_v59 = vpop.f32.mrf.mxu3 }
 0x196   :  { %v1594_v60 = vsel %vm1359_vm3, %v1221_v58, -inf  ;;  %v1004_v61 = vpop.f32.mrf.mxu0  ;;  %v1114_v62 = vpop.f32.mrf.mxu1  ;;  %v1596_v1 = vsel %vm1359_vm3, %v1331_v59, -inf }
 0x197   :  { %v1792_v63 = vpack.c.bf16 %v1748_v56, %v1748_v56  ;;  %v1595_v0 = vmax.f32 %v1593_v57, %v1594_v60  ;;  %v1598_v2 = vsel %vm1359_vm3, %v1004_v61, -inf  ;;  %v1599_v3 = vsel %vm1359_vm3, %v1114_v62, -inf }
 0x198   :  { %v1600_v6 = vmax.f32 %v1598_v2, %v1599_v3 }
 0x199   :  { %1837 = vst.msk [vmem:[%s3180_s3 + $0x80] sm:$0xf] %vm1804_vm4, %v1792_v63  ;;  %v1597_v4 = vmax.f32 %v1595_v0, %v1596_v1 }
 0x19b   :  { %v1705_v5 = vadd.f32 %v3028_v46, %v1597_v4 }
 0x19d   :  { %v1749_v7 = vmax.f32 %v1705_v5, 0.0  ;;  %v1224_v8 = vpop.f32.mrf.mxu2  ;;  %v1334_v9 = vpop.f32.mrf.mxu3 }
 0x19e   :  { %v1601_v10 = vsel %vm1359_vm3, %v1224_v8, -inf  ;;  %v1603_v11 = vsel %vm1359_vm3, %v1334_v9, -inf  ;;  %v1006_v12 = vpop.f32.mrf.mxu0  ;;  %v1116_v13 = vpop.f32.mrf.mxu1 }
 0x19f   :  { %v1793_v14 = vpack.c.bf16 %v1749_v7, %v1749_v7  ;;  %v1602_v15 = vmax.f32 %v1600_v6, %v1601_v10  ;;  %v1605_v17 = vsel %vm1359_vm3, %v1006_v12, -inf  ;;  %v1606_v18 = vsel %vm1359_vm3, %v1116_v13, -inf }
 0x1a0   :  { %v1607_v21 = vmax.f32 %v1605_v17, %v1606_v18 }
 0x1a1   :  { %1838 = vst.msk [vmem:[%s3180_s3 + $0x84] sm:$0xf] %vm1804_vm4, %v1793_v14  ;;  %v1604_v16 = vmax.f32 %v1602_v15, %v1603_v11 }
 0x1a3   :  { %v1706_v19 = vadd.f32 %v3028_v46, %v1604_v16 }
 0x1a5   :  { %v1750_v20 = vmax.f32 %v1706_v19, 0.0  ;;  %v1226_v22 = vpop.f32.mrf.mxu2  ;;  %v1336_v23 = vpop.f32.mrf.mxu3 }
 0x1a6   :  { %v1608_v24 = vsel %vm1359_vm3, %v1226_v22, -inf  ;;  %v1009_v25 = vpop.f32.mrf.mxu0  ;;  %v1119_v26 = vpop.f32.mrf.mxu1  ;;  %v1610_v29 = vsel %vm1359_vm3, %v1336_v23, -inf }
 0x1a7   :  { %v1794_v27 = vpack.c.bf16 %v1750_v20, %v1750_v20  ;;  %v1609_v28 = vmax.f32 %v1607_v21, %v1608_v24  ;;  %v1612_v30 = vsel %vm1359_vm3, %v1009_v25, -inf  ;;  %v1613_v31 = vsel %vm1359_vm3, %v1119_v26, -inf }
 0x1a8   :  { %v1614_v34 = vmax.f32 %v1612_v30, %v1613_v31 }
 0x1a9   :  { %1839 = vst.msk [vmem:[%s3180_s3 + $0x88] sm:$0xf] %vm1804_vm4, %v1794_v27  ;;  %v1611_v32 = vmax.f32 %v1609_v28, %v1610_v29 }
 0x1ab   :  { %v1707_v33 = vadd.f32 %v3028_v46, %v1611_v32 }
 0x1ad   :  { %v1751_v35 = vmax.f32 %v1707_v33, 0.0  ;;  %v1229_v36 = vpop.f32.mrf.mxu2  ;;  %v1339_v37 = vpop.f32.mrf.mxu3 }
 0x1ae   :  { %v1615_v38 = vsel %vm1359_vm3, %v1229_v36, -inf  ;;  %v1617_v39 = vsel %vm1359_vm3, %v1339_v37, -inf  ;;  %v1011_v40 = vpop.f32.mrf.mxu0  ;;  %v1121_v41 = vpop.f32.mrf.mxu1 }
 0x1af   :  { %v1795_v42 = vpack.c.bf16 %v1751_v35, %v1751_v35  ;;  %v1616_v43 = vmax.f32 %v1614_v34, %v1615_v38  ;;  %v1619_v45 = vsel %vm1359_vm3, %v1011_v40, -inf  ;;  %v1620_v55 = vsel %vm1359_vm3, %v1121_v41, -inf }
 0x1b0   :  { %v1621_v49 = vmax.f32 %v1619_v45, %v1620_v55 }
 0x1b1   :  { %1840 = vst.msk [vmem:[%s3180_s3 + $0x8c] sm:$0xf] %vm1804_vm4, %v1795_v42  ;;  %v1618_v44 = vmax.f32 %v1616_v43, %v1617_v39 }
 0x1b3   :  { %v1708_v47 = vadd.f32 %v3028_v46, %v1618_v44 }
 0x1b5   :  { %v1752_v48 = vmax.f32 %v1708_v47, 0.0  ;;  %v1231_v50 = vpop.f32.mrf.mxu2  ;;  %v1341_v51 = vpop.f32.mrf.mxu3 }
 0x1b6   :  { %v1622_v52 = vsel %vm1359_vm3, %v1231_v50, -inf  ;;  %v1014_v53 = vpop.f32.mrf.mxu0  ;;  %v1124_v54 = vpop.f32.mrf.mxu1  ;;  %v1624_v58 = vsel %vm1359_vm3, %v1341_v51, -inf }
 0x1b7   :  { %v1796_v56 = vpack.c.bf16 %v1752_v48, %v1752_v48  ;;  %v1623_v57 = vmax.f32 %v1621_v49, %v1622_v52  ;;  %v1626_v59 = vsel %vm1359_vm3, %v1014_v53, -inf  ;;  %v1627_v60 = vsel %vm1359_vm3, %v1124_v54, -inf }
 0x1b8   :  { %v1628_v63 = vmax.f32 %v1626_v59, %v1627_v60 }
 0x1b9   :  { %1841 = vst.msk [vmem:[%s3180_s3 + $0x90] sm:$0xf] %vm1804_vm4, %v1796_v56  ;;  %v1625_v61 = vmax.f32 %v1623_v57, %v1624_v58 }
 0x1bb   :  { %v1709_v62 = vadd.f32 %v3028_v46, %v1625_v61 }
 0x1bd   :  { %v1753_v0 = vmax.f32 %v1709_v62, 0.0  ;;  %v1234_v1 = vpop.f32.mrf.mxu2  ;;  %v1344_v2 = vpop.f32.mrf.mxu3 }
 0x1be   :  { %v1629_v3 = vsel %vm1359_vm3, %v1234_v1, -inf  ;;  %v1631_v4 = vsel %vm1359_vm3, %v1344_v2, -inf  ;;  %v1016_v5 = vpop.f32.mrf.mxu0  ;;  %v1126_v6 = vpop.f32.mrf.mxu1 }
 0x1bf   :  { %v1797_v7 = vpack.c.bf16 %v1753_v0, %v1753_v0  ;;  %v1630_v8 = vmax.f32 %v1628_v63, %v1629_v3  ;;  %v1633_v10 = vsel %vm1359_vm3, %v1016_v5, -inf  ;;  %v1634_v11 = vsel %vm1359_vm3, %v1126_v6, -inf }
 0x1c0   :  { %v1635_v14 = vmax.f32 %v1633_v10, %v1634_v11 }
 0x1c1   :  { %1842 = vst.msk [vmem:[%s3180_s3 + $0x94] sm:$0xf] %vm1804_vm4, %v1797_v7  ;;  %v1632_v9 = vmax.f32 %v1630_v8, %v1631_v4 }
 0x1c3   :  { %v1710_v12 = vadd.f32 %v3028_v46, %v1632_v9 }
 0x1c5   :  { %v1754_v13 = vmax.f32 %v1710_v12, 0.0  ;;  %v1236_v15 = vpop.f32.mrf.mxu2  ;;  %v1346_v16 = vpop.f32.mrf.mxu3 }
 0x1c6   :  { %v1636_v17 = vsel %vm1359_vm3, %v1236_v15, -inf  ;;  %v1019_v18 = vpop.f32.mrf.mxu0  ;;  %v1129_v19 = vpop.f32.mrf.mxu1  ;;  %v1638_v22 = vsel %vm1359_vm3, %v1346_v16, -inf }
 0x1c7   :  { %v1798_v20 = vpack.c.bf16 %v1754_v13, %v1754_v13  ;;  %v1637_v21 = vmax.f32 %v1635_v14, %v1636_v17  ;;  %v1640_v23 = vsel %vm1359_vm3, %v1019_v18, -inf  ;;  %v1641_v24 = vsel %vm1359_vm3, %v1129_v19, -inf }
 0x1c8   :  { %v1642_v27 = vmax.f32 %v1640_v23, %v1641_v24 }
 0x1c9   :  { %1843 = vst.msk [vmem:[%s3180_s3 + $0x98] sm:$0xf] %vm1804_vm4, %v1798_v20  ;;  %v1639_v25 = vmax.f32 %v1637_v21, %v1638_v22 }
 0x1cb   :  { %v1711_v26 = vadd.f32 %v3028_v46, %v1639_v25 }
 0x1cd   :  { %v1755_v28 = vmax.f32 %v1711_v26, 0.0  ;;  %v1239_v29 = vpop.f32.mrf.mxu2  ;;  %v1349_v30 = vpop.f32.mrf.mxu3 }
 0x1ce   :  { %v1643_v31 = vsel %vm1359_vm3, %v1239_v29, -inf  ;;  %v1645_v32 = vsel %vm1359_vm3, %v1349_v30, -inf  ;;  %v1021_v33 = vpop.f32.mrf.mxu0  ;;  %v1131_v34 = vpop.f32.mrf.mxu1 }
 0x1cf   :  { %v1799_v35 = vpack.c.bf16 %v1755_v28, %v1755_v28  ;;  %v1644_v36 = vmax.f32 %v1642_v27, %v1643_v31  ;;  %v1647_v38 = vsel %vm1359_vm3, %v1021_v33, -inf  ;;  %v1648_v39 = vsel %vm1359_vm3, %v1131_v34, -inf }
 0x1d0   :  { %v1649_v42 = vmax.f32 %v1647_v38, %v1648_v39 }
 0x1d1   :  { %1844 = vst.msk [vmem:[%s3180_s3 + $0x9c] sm:$0xf] %vm1804_vm4, %v1799_v35  ;;  %v1646_v37 = vmax.f32 %v1644_v36, %v1645_v32 }
 0x1d3   :  { %v1712_v40 = vadd.f32 %v3028_v46, %v1646_v37 }
 0x1d5   :  { %v1756_v41 = vmax.f32 %v1712_v40, 0.0  ;;  %v1241_v43 = vpop.f32.mrf.mxu2  ;;  %v1351_v44 = vpop.f32.mrf.mxu3 }
 0x1d6   :  { %v1650_v45 = vsel %vm1359_vm3, %v1241_v43, -inf  ;;  %v1024_v55 = vpop.f32.mrf.mxu0  ;;  %v1134_v47 = vpop.f32.mrf.mxu1  ;;  %v1652_v50 = vsel %vm1359_vm3, %v1351_v44, -inf }
 0x1d7   :  { %v1800_v48 = vpack.c.bf16 %v1756_v41, %v1756_v41  ;;  %v1651_v49 = vmax.f32 %v1649_v42, %v1650_v45  ;;  %v1654_v51 = vsel %vm1359_vm3, %v1024_v55, -inf  ;;  %v1655_v52 = vsel %vm1359_vm3, %v1134_v47, -inf }
 0x1d8   :  { %v1656_v56 = vmax.f32 %v1654_v51, %v1655_v52 }
 0x1d9   :  { %1845 = vst.msk [vmem:[%s3180_s3 + $0xa0] sm:$0xf] %vm1804_vm4, %v1800_v48  ;;  %v1653_v53 = vmax.f32 %v1651_v49, %v1652_v50 }
 0x1db   :  { %v1713_v54 = vadd.f32 %v3028_v46, %v1653_v53 }
 0x1dd   :  { %v1757_v57 = vmax.f32 %v1713_v54, 0.0  ;;  %v1244_v58 = vpop.f32.mrf.mxu2  ;;  %v1354_v59 = vpop.f32.mrf.mxu3 }
 0x1de   :  { %v1657_v60 = vsel %vm1359_vm3, %v1244_v58, -inf  ;;  %v1659_v61 = vsel %vm1359_vm3, %v1354_v59, -inf  ;;  %v1026_v0 = vpop.f32.mrf.mxu0  ;;  %v1136_v1 = vpop.f32.mrf.mxu1 }
 0x1df   :  { %v1801_v62 = vpack.c.bf16 %v1757_v57, %v1757_v57  ;;  %v1658_v63 = vmax.f32 %v1656_v56, %v1657_v60  ;;  %v1661_v3 = vsel %vm1359_vm3, %v1026_v0, -inf  ;;  %v1662_v4 = vsel %vm1359_vm3, %v1136_v1, -inf }
 0x1e0   :  { %v1663_v7 = vmax.f32 %v1661_v3, %v1662_v4 }
 0x1e1   :  { %1846 = vst.msk [vmem:[%s3180_s3 + $0xa4] sm:$0xf] %vm1804_vm4, %v1801_v62  ;;  %v1660_v2 = vmax.f32 %v1658_v63, %v1659_v61 }
 0x1e3   :  { %v1714_v5 = vadd.f32 %v3028_v46, %v1660_v2 }
 0x1e5   :  { %v1758_v6 = vmax.f32 %v1714_v5, 0.0  ;;  %v1246_v8 = vpop.f32.mrf.mxu2  ;;  %v1356_v9 = vpop.f32.mrf.mxu3 }
 0x1e6   :  { %v1664_v10 = vsel %vm1359_vm3, %v1246_v8, -inf  ;;  %v1666_v13 = vsel %vm1359_vm3, %v1356_v9, -inf }
 0x1e7   :  { %v1802_v11 = vpack.c.bf16 %v1758_v6, %v1758_v6  ;;  %v1665_v12 = vmax.f32 %v1663_v7, %v1664_v10 }
 0x1e9   :  { %1847 = vst.msk [vmem:[%s3180_s3 + $0xa8] sm:$0xf] %vm1804_vm4, %v1802_v11  ;;  %v1667_v14 = vmax.f32 %v1665_v12, %v1666_v13 }
 0x1eb   :  { %v1715_v15 = vadd.f32 %v3028_v46, %v1667_v14 }
 0x1ed   :  { %v1759_v16 = vmax.f32 %v1715_v15, 0.0 }
 0x1ef   :  { %v1803_v17 = vpack.c.bf16 %v1759_v16, %v1759_v16 }
 0x1f1   :  { %1848 = vst.msk [vmem:[%s3180_s3 + $0xac] sm:$0xf] %vm1804_vm4, %v1803_v17 }

// kernel: digit_cnn_forward.4
= control target key start
LH: loop header
LB: loop body
LE: loop exit
PB: predicated region body
PF: predicated region fallthrough
CT: control target
= control target key end

     0   :  { %vm463_vm0 = vcmask 261120   ;;  %vm779_vm1 = vcmask 523264   ;;  %vm864_vm2 = vcmask 519168   ;;  %s1846_s1 = inlined_call_operand.vmem [shape: bf16[288,64], index: 1, kind: input, shape index: {}]   ;;  %s1847_s0 = inlined_call_operand.vmem [shape: bf16[4,64,288], index: 0, kind: input, shape index: {}]   ;;  %s1848_s2 = inlined_call_operand.vmem [shape: f32[1,64], index: 2, kind: input, shape index: {}]   ;;  %s1849_s3 = inlined_call_operand.vmem [shape: bf16[64,64], index: 3, kind: output, shape index: {}]  }
   0x1   :  { %v1212_v0 = vld [vmem:[%s1846_s1 + $0x38] sm:$0xff]  ;;  %v1271_v2 = vld [vmem:[%s1846_s1 + $0x88] sm:$0xff]  ;;  %v1211_v3 = vld [vmem:[%s1846_s1 + $0x30] sm:$0xff] }
   0x2   :  { %v1220_v1 = vld [vmem:[%s1846_s1 + $0x78] sm:$0xff]  ;;  %512 = vmatpush.bf16.msra.mxu0 %v1212_v0  ;;  %1223 = vmatpush.bf16.msra.mxu3 %v1212_v0  ;;  %v1219_v4 = vld [vmem:[%s1846_s1 + $0x70] sm:$0xff]  ;;  %v1283_v5 = vld [vmem:[%s1846_s1 + $0x80] sm:$0xff] }
   0x3   :  { %601 = vmatpush.bf16.msra.mxu1 %v1220_v1  ;;  %696 = vmatpush.bf16.msra.mxu2 %v1271_v2  ;;  %v887_v6 = vld [vmem:[%s1847_s0 + $0x8] sm:$0xf]  ;;  %v1159_v7 = vld [vmem:[%s1847_s0 + $0x10] sm:$0xf0]  ;;  %v1209_v11 = vld [vmem:[%s1846_s1 + $0x20] sm:$0xff] }
   0x4   :  { %v888_v8 = vor.u32 %v1159_v7, %v887_v6  ;;  %v1210_v9 = vld [vmem:[%s1846_s1 + $0x28] sm:$0xff]  ;;  %v1217_v12 = vld [vmem:[%s1846_s1 + $0x60] sm:$0xff]  ;;  %v1208_v13 = vld [vmem:[%s1846_s1 + $0x18] sm:$0xff] }
   0x5   :  { %v1218_v10 = vld [vmem:[%s1846_s1 + $0x68] sm:$0xff]  ;;  %v1216_v14 = vld [vmem:[%s1846_s1 + $0x58] sm:$0xff]  ;;  %v1207_v15 = vld [vmem:[%s1846_s1 + $0x10] sm:$0xff] }
   0x6   :  { %513 = vmatpush.bf16.msra.mxu0 %v1211_v3  ;;  %1224 = vmatpush.bf16.msra.mxu3 %v1211_v3  ;;  %v1215_v16 = vld [vmem:[%s1846_s1 + $0x50] sm:$0xff]  ;;  %v899_v17 = vld [vmem:[%s1847_s0 + $0x20] sm:$0xf]  ;;  %v1162_v18 = vld [vmem:[%s1847_s0 + $0x28] sm:$0xf0] }
   0x7   :  { %602 = vmatpush.bf16.msra.mxu1 %v1219_v4  ;;  %697 = vmatpush.bf16.msra.mxu2 %v1283_v5  ;;  %v900_v19 = vor.u32 %v1162_v18, %v899_v17  ;;  %v1206_v20 = vld [vmem:[%s1846_s1 + $0x8] sm:$0xff]  ;;  %v1205_v22 = vld [vmem:[%s1846_s1] sm:$0xff]  ;;  %v881_v29 = vld [vmem:[%s1847_s0 + $0xc] sm:$0xf0] }
   0x8   :  { %v1214_v21 = vld [vmem:[%s1846_s1 + $0x48] sm:$0xff]  ;;  %v1213_v23 = vld [vmem:[%s1846_s1 + $0x40] sm:$0xff]  ;;  %v911_v33 = vld [vmem:[%s1847_s0 + $0x38] sm:$0xf] }
   0x9   :  { %v879_v24 = vld [vmem:[%s1847_s0] sm:$0xf]  ;;  %v1158_v25 = vld [vmem:[%s1847_s0 + $0x8] sm:$0xf0]  ;;  %v1157_v28 = vld [vmem:[%s1847_s0 + $0x4] sm:$0xf] }
   0xa   :  { %1141 = vmatmul.msk.bf16.vlgmr.msra.gmra.mxu2 %vm463_vm0, %v888_v8  ;;  %514 = vmatpush.bf16.msra.mxu0 %v1210_v9  ;;  %v1023_v26 = vld [vmem:[%s1847_s0 + $0x120] sm:$0xf]  ;;  %v1194_v27 = vld [vmem:[%s1847_s0 + $0x128] sm:$0xf0]  ;;  %v880_v30 = vor.u32 %v1158_v25, %v879_v24  ;;  %v884_v32 = vor.u32 %v1157_v28, %v881_v29  ;;  %v1165_v34 = vld [vmem:[%s1847_s0 + $0x40] sm:$0xf0] }
   0xb   :  { %1225 = vmatpush.bf16.msra.mxu3 %v1210_v9  ;;  %603 = vmatpush.bf16.msra.mxu1 %v1218_v10  ;;  %v1024_v31 = vor.u32 %v1194_v27, %v1023_v26  ;;  %v912_v35 = vor.u32 %v1165_v34, %v911_v33  ;;  %v891_v36 = vld [vmem:[%s1847_s0 + $0x18] sm:$0xf]  ;;  %v1161_v37 = vld [vmem:[%s1847_s0 + $0x20] sm:$0xf0]  ;;  %v1160_v40 = vld [vmem:[%s1847_s0 + $0x1c] sm:$0xf] }
   0xc   :  { %v1035_v38 = vld [vmem:[%s1847_s0 + $0x138] sm:$0xf]  ;;  %v1197_v39 = vld [vmem:[%s1847_s0 + $0x140] sm:$0xf0]  ;;  %v893_v41 = vld [vmem:[%s1847_s0 + $0x24] sm:$0xf0]  ;;  %v892_v42 = vor.u32 %v1161_v37, %v891_v36 }
   0xd   :  { %v1036_v43 = vor.u32 %v1197_v39, %v1035_v38  ;;  %v896_v44 = vor.u32 %v1160_v40, %v893_v41  ;;  %v923_v45 = vld [vmem:[%s1847_s0 + $0x50] sm:$0xf]  ;;  %v1168_v46 = vld [vmem:[%s1847_s0 + $0x58] sm:$0xf0]  ;;  %v1163_v52 = vld [vmem:[%s1847_s0 + $0x34] sm:$0xf] }
   0xe   :  { %515 = vmatpush.bf16.msra.mxu0 %v1209_v11  ;;  %v924_v47 = vor.u32 %v1168_v46, %v923_v45  ;;  %v903_v48 = vld [vmem:[%s1847_s0 + $0x30] sm:$0xf]  ;;  %v1164_v49 = vld [vmem:[%s1847_s0 + $0x38] sm:$0xf0]  ;;  %v905_v53 = vld [vmem:[%s1847_s0 + $0x3c] sm:$0xf0] }
   0xf   :  { %1226 = vmatpush.bf16.msra.mxu3 %v1209_v11  ;;  %604 = vmatpush.bf16.msra.mxu1 %v1217_v12  ;;  %v1047_v50 = vld [vmem:[%s1847_s0 + $0x150] sm:$0xf]  ;;  %v1200_v51 = vld [vmem:[%s1847_s0 + $0x158] sm:$0xf0]  ;;  %v904_v54 = vor.u32 %v1164_v49, %v903_v48  ;;  %v908_v56 = vor.u32 %v1163_v52, %v905_v53  ;;  %v935_v57 = vld [vmem:[%s1847_s0 + $0x68] sm:$0xf] }
  0x10   :  { %v1048_v55 = vor.u32 %v1200_v51, %v1047_v50  ;;  %v1171_v58 = vld [vmem:[%s1847_s0 + $0x70] sm:$0xf0]  ;;  %v915_v60 = vld [vmem:[%s1847_s0 + $0x48] sm:$0xf]  ;;  %v1166_v0 = vld [vmem:[%s1847_s0 + $0x4c] sm:$0xf] }
  0x11   :  { %v936_v59 = vor.u32 %v1171_v58, %v935_v57  ;;  %v1167_v61 = vld [vmem:[%s1847_s0 + $0x50] sm:$0xf0]  ;;  %v1059_v62 = vld [vmem:[%s1847_s0 + $0x168] sm:$0xf]  ;;  %v1174_v6 = vld [vmem:[%s1847_s0 + $0x88] sm:$0xf0] }
  0x12   :  { %516 = vmatpush.bf16.msra.mxu0 %v1208_v13  ;;  %v1203_v63 = vld [vmem:[%s1847_s0 + $0x170] sm:$0xf0]  ;;  %v927_v8 = vld [vmem:[%s1847_s0 + $0x60] sm:$0xf]  ;;  %v1170_v9 = vld [vmem:[%s1847_s0 + $0x68] sm:$0xf0] }
  0x13   :  { %1227 = vmatpush.bf16.msra.mxu3 %v1208_v13  ;;  %605 = vmatpush.bf16.msra.mxu1 %v1216_v14  ;;  %v1060_v3 = vor.u32 %v1203_v63, %v1059_v62  ;;  %v929_v11 = vld [vmem:[%s1847_s0 + $0x6c] sm:$0xf0]  ;;  %v959_v17 = vld [vmem:[%s1847_s0 + $0x98] sm:$0xf]  ;;  %v1177_v18 = vld [vmem:[%s1847_s0 + $0xa0] sm:$0xf0] }
  0x14   :  { %v1025_v13 = vld [vmem:[%s1847_s0 + $0x12c] sm:$0xf0]  ;;  %v1196_v24 = vld [vmem:[%s1847_s0 + $0x13c] sm:$0xf]  ;;  %v1037_v25 = vld [vmem:[%s1847_s0 + $0x144] sm:$0xf0] }
  0x15   :  { %v1040_v28 = vor.u32 %v1196_v24, %v1037_v25  ;;  %v971_v29 = vld [vmem:[%s1847_s0 + $0xb0] sm:$0xf]  ;;  %v1176_v33 = vld [vmem:[%s1847_s0 + $0x98] sm:$0xf0]  ;;  %v1175_v34 = vld [vmem:[%s1847_s0 + $0x94] sm:$0xf] }
  0x16   :  { %517 = vmatpush.bf16.msra.mxu0 %v1207_v15  ;;  %v1199_v36 = vld [vmem:[%s1847_s0 + $0x154] sm:$0xf]  ;;  %v1049_v37 = vld [vmem:[%s1847_s0 + $0x15c] sm:$0xf0]  ;;  %v983_v41 = vld [vmem:[%s1847_s0 + $0xc8] sm:$0xf] }
  0x17   :  { %1228 = vmatpush.bf16.msra.mxu3 %v1207_v15  ;;  %606 = vmatpush.bf16.msra.mxu1 %v1215_v16  ;;  %v1052_v40 = vor.u32 %v1199_v36, %v1049_v37  ;;  %v1179_v45 = vld [vmem:[%s1847_s0 + $0xb0] sm:$0xf0]  ;;  %v1178_v46 = vld [vmem:[%s1847_s0 + $0xac] sm:$0xf]  ;;  %v1061_v49 = vld [vmem:[%s1847_s0 + $0x174] sm:$0xf0] }
  0x18   :  { %v1202_v48 = vld [vmem:[%s1847_s0 + $0x16c] sm:$0xf]  ;;  %v975_v58 = vld [vmem:[%s1847_s0 + $0xc0] sm:$0xf]  ;;  %v1055_v62 = vld [vmem:[%s1847_s0 + $0x158] sm:$0xf] }
  0x19   :  { %v1064_v53 = vor.u32 %v1202_v48, %v1061_v49  ;;  %v1201_v63 = vld [vmem:[%s1847_s0 + $0x160] sm:$0xf0] }
  0x1a   :  { %1142 = vmatmul.msk.bf16.gmra.mxu2 %vm463_vm0, %v900_v19  ;;  %518 = vmatpush.bf16.msra.mxu0 %v1206_v20  ;;  %v960_v19 = vor.u32 %v1177_v18, %v959_v17  ;;  %v987_v17 = vld [vmem:[%s1847_s0 + $0xd8] sm:$0xf]  ;;  %v1185_v18 = vld [vmem:[%s1847_s0 + $0xe0] sm:$0xf0] }
  0x1b   :  { %1229 = vmatpush.bf16.msra.mxu3 %v1206_v20  ;;  %607 = vmatpush.bf16.msra.mxu1 %v1214_v21  ;;  %v939_v20 = vld [vmem:[%s1847_s0 + $0x78] sm:$0xf]  ;;  %v988_v25 = vor.u32 %v1185_v18, %v987_v17 }
  0x1e   :  { %519 = vmatpush.bf16.msra.mxu0 %v1205_v22 }
  0x1f   :  { %1230 = vmatpush.bf16.msra.mxu3 %v1205_v22  ;;  %608 = vmatpush.bf16.msra.mxu1 %v1213_v23  ;;  %v1172_v22 = vld [vmem:[%s1847_s0 + $0x7c] sm:$0xf] }
  0x21   :  { %520 = vmatmul.bf16.vlgmr.msra.gmra.mxu0 %v880_v30  ;;  %v1180_v30 = vld [vmem:[%s1847_s0 + $0xb8] sm:$0xf0] }
  0x22   :  { %580 = vmatmul.bf16.vlgmr.msra.gmra.mxu3 %v1024_v31  ;;  %609 = vmatmul.bf16.vlgmr.msra.gmra.mxu1 %v884_v32  ;;  %v972_v31 = vor.u32 %v1180_v30, %v971_v29  ;;  %v951_v32 = vld [vmem:[%s1847_s0 + $0x90] sm:$0xf] }
  0x23   :  { %1231 = vmatpush.bf16.msrb.mxu3 %v1220_v1  ;;  %v917_v1 = vld [vmem:[%s1847_s0 + $0x54] sm:$0xf0]  ;;  %v952_v38 = vor.u32 %v1176_v33, %v951_v32  ;;  %v1019_v32 = vld [vmem:[%s1847_s0 + $0x110] sm:$0xf]  ;;  %v1192_v33 = vld [vmem:[%s1847_s0 + $0x118] sm:$0xf0] }
  0x24   :  { %v1020_v37 = vor.u32 %v1192_v33, %v1019_v32 }
  0x27   :  { %1232 = vmatpush.bf16.msrb.mxu3 %v1219_v4  ;;  %v920_v4 = vor.u32 %v1166_v0, %v917_v1 }
  0x2a   :  { %1143 = vmatmul.msk.bf16.gmra.mxu2 %vm463_vm0, %v912_v35  ;;  %v953_v35 = vld [vmem:[%s1847_s0 + $0x9c] sm:$0xf0] }
  0x2b   :  { %1233 = vmatpush.bf16.msrb.mxu3 %v1218_v10  ;;  %v1169_v10 = vld [vmem:[%s1847_s0 + $0x64] sm:$0xf]  ;;  %v956_v39 = vor.u32 %v1175_v34, %v953_v35 }
  0x2c   :  { %v932_v15 = vor.u32 %v1169_v10, %v929_v11 }
  0x2f   :  { %1234 = vmatpush.bf16.msrb.mxu3 %v1217_v12  ;;  %v1193_v12 = vld [vmem:[%s1847_s0 + $0x124] sm:$0xf] }
  0x31   :  { %525 = vmatmul.bf16.gmra.mxu0 %v892_v42  ;;  %v1183_v42 = vld [vmem:[%s1847_s0 + $0xd0] sm:$0xf0] }
  0x32   :  { %585 = vmatmul.bf16.gmra.mxu3 %v1036_v43  ;;  %614 = vmatmul.bf16.gmra.mxu1 %v896_v44  ;;  %v984_v43 = vor.u32 %v1183_v42, %v983_v41  ;;  %v963_v44 = vld [vmem:[%s1847_s0 + $0xa8] sm:$0xf]  ;;  %v999_v41 = vld [vmem:[%s1847_s0 + $0xf0] sm:$0xf]  ;;  %v1188_v42 = vld [vmem:[%s1847_s0 + $0xf8] sm:$0xf0] }
  0x33   :  { %1235 = vmatpush.bf16.msrb.mxu3 %v1216_v14  ;;  %v928_v14 = vor.u32 %v1170_v9, %v927_v8  ;;  %v964_v51 = vor.u32 %v1179_v45, %v963_v44  ;;  %v1007_v8 = vld [vmem:[%s1847_s0 + $0xf8] sm:$0xf]  ;;  %v1189_v9 = vld [vmem:[%s1847_s0 + $0x100] sm:$0xf0]  ;;  %v1001_v44 = vld [vmem:[%s1847_s0 + $0xfc] sm:$0xf0] }
  0x37   :  { %1236 = vmatpush.bf16.msrb.mxu3 %v1215_v16  ;;  %v1028_v16 = vor.u32 %v1193_v12, %v1025_v13  ;;  %v1008_v13 = vor.u32 %v1189_v9, %v1007_v8 }
  0x3a   :  { %1144 = vmatmul.msk.bf16.gmra.mxu2 %vm463_vm0, %v924_v47  ;;  %v965_v47 = vld [vmem:[%s1847_s0 + $0xb4] sm:$0xf0] }
  0x3b   :  { %1237 = vmatpush.bf16.msrb.mxu3 %v1214_v21  ;;  %v1173_v21 = vld [vmem:[%s1847_s0 + $0x80] sm:$0xf0]  ;;  %v968_v52 = vor.u32 %v1178_v46, %v965_v47  ;;  %v1000_v47 = vor.u32 %v1188_v42, %v999_v41 }
  0x3c   :  { %v940_v26 = vor.u32 %v1173_v21, %v939_v20  ;;  %v989_v20 = vld [vmem:[%s1847_s0 + $0xe4] sm:$0xf0]  ;;  %v1067_v21 = vld [vmem:[%s1847_s0 + $0x170] sm:$0xf] }
  0x3f   :  { %1238 = vmatpush.bf16.msrb.mxu3 %v1213_v23  ;;  %v941_v23 = vld [vmem:[%s1847_s0 + $0x84] sm:$0xf0] }
  0x40   :  { %v944_v27 = vor.u32 %v1172_v22, %v941_v23  ;;  %v1204_v22 = vld [vmem:[%s1847_s0 + $0x178] sm:$0xf0] }
  0x41   :  { %530 = vmatmul.bf16.gmra.mxu0 %v904_v54  ;;  %v995_v54 = vld [vmem:[%s1847_s0 + $0xe0] sm:$0xf] }
  0x42   :  { %590 = vmatmul.bf16.gmra.mxu3 %v1048_v55  ;;  %619 = vmatmul.bf16.gmra.mxu1 %v908_v56  ;;  %v1186_v55 = vld [vmem:[%s1847_s0 + $0xe8] sm:$0xf0] }
  0x43   :  { %1239 = vmatpush.bf16.msra.mxu3 %v1271_v2  ;;  %v916_v2 = vor.u32 %v1167_v61, %v915_v60  ;;  %v996_v57 = vor.u32 %v1186_v55, %v995_v54  ;;  %v1181_v60 = vld [vmem:[%s1847_s0 + $0xc4] sm:$0xf]  ;;  %v977_v61 = vld [vmem:[%s1847_s0 + $0xcc] sm:$0xf0]  ;;  %v1195_v54 = vld [vmem:[%s1847_s0 + $0x130] sm:$0xf0] }
  0x47   :  { %1240 = vmatpush.bf16.msra.mxu3 %v1283_v5  ;;  %v947_v5 = vld [vmem:[%s1847_s0 + $0x80] sm:$0xf] }
  0x48   :  { %v948_v7 = vor.u32 %v1174_v6, %v947_v5 }
  0x4a   :  { %1145 = vmatmul.msk.bf16.gmra.mxu2 %vm463_vm0, %v936_v59  ;;  %v1182_v59 = vld [vmem:[%s1847_s0 + $0xc8] sm:$0xf0] }
  0x4b   :  { %v976_v1 = vor.u32 %v1182_v59, %v975_v58 }
  0x51   :  { %535 = vmatmul.bf16.gmra.mxu0 %v916_v2 }
  0x52   :  { %595 = vmatmul.bf16.gmra.mxu3 %v1060_v3  ;;  %624 = vmatmul.bf16.gmra.mxu1 %v920_v4  ;;  %v980_v3 = vor.u32 %v1181_v60, %v977_v61  ;;  %v1056_v4 = vor.u32 %v1201_v63, %v1055_v62  ;;  %v1011_v62 = vld [vmem:[%s1847_s0 + $0x108] sm:$0xf]  ;;  %v1191_v63 = vld [vmem:[%s1847_s0 + $0x110] sm:$0xf0] }
  0x5a   :  { %1146 = vmatmul.msk.bf16.gmra.mxu2 %vm463_vm0, %v948_v7 }
  0x61   :  { %540 = vmatmul.bf16.gmra.mxu0 %v928_v14 }
  0x62   :  { %629 = vmatmul.bf16.gmra.mxu1 %v932_v15  ;;  %669 = vmatmul.bf16.vlgmr.msrb.gmra.mxu3 %v1028_v16 }
  0x6a   :  { %1147 = vmatmul.msk.bf16.gmra.mxu2 %vm463_vm0, %v960_v19  ;;  %v1184_v19 = vld [vmem:[%s1847_s0 + $0xdc] sm:$0xf] }
  0x71   :  { %545 = vmatmul.bf16.gmra.mxu0 %v940_v26 }
  0x72   :  { %634 = vmatmul.bf16.gmra.mxu1 %v944_v27  ;;  %674 = vmatmul.bf16.gmra.mxu3 %v1040_v28  ;;  %v992_v27 = vor.u32 %v1184_v19, %v989_v20  ;;  %v1068_v28 = vor.u32 %v1204_v22, %v1067_v21 }
  0x7a   :  { %1148 = vmatmul.msk.bf16.gmra.mxu2 %vm463_vm0, %v972_v31 }
  0x81   :  { %550 = vmatmul.bf16.gmra.mxu0 %v952_v38 }
  0x82   :  { %639 = vmatmul.bf16.gmra.mxu1 %v956_v39  ;;  %679 = vmatmul.bf16.gmra.mxu3 %v1052_v40 }
  0x8a   :  { %1149 = vmatmul.msk.bf16.gmra.mxu2 %vm463_vm0, %v984_v43  ;;  %v1187_v43 = vld [vmem:[%s1847_s0 + $0xf4] sm:$0xf] }
  0x8b   :  { %v1004_v49 = vor.u32 %v1187_v43, %v1001_v44 }
  0x8d   :  { %v699_v50 = vpop.f32.mrf.mxu2 }
  0x91   :  { %555 = vmatmul.bf16.gmra.mxu0 %v964_v51 }
  0x92   :  { %644 = vmatmul.bf16.gmra.mxu1 %v968_v52  ;;  %684 = vmatmul.bf16.gmra.mxu3 %v1064_v53  ;;  %v1031_v53 = vld [vmem:[%s1847_s0 + $0x128] sm:$0xf] }
  0x93   :  { %v1032_v58 = vor.u32 %v1195_v54, %v1031_v53 }
  0x95   :  { %v701_v56 = vpop.f32.mrf.mxu2 }
  0x9a   :  { %1150 = vmatmul.msk.bf16.gmra.mxu2 %vm463_vm0, %v996_v57 }
  0x9d   :  { %v704_v0 = vpop.f32.mrf.mxu2 }
  0x9e   :  { %v521_v2 = vpop.f32.mrf.mxu0 }
  0x9f   :  { %v610_v5 = vpop.f32.mrf.mxu1 }
  0xa0   :  { %v611_v6 = vadd.f32 %v610_v5, %v521_v2 }
  0xa1   :  { %560 = vmatmul.bf16.gmra.mxu0 %v976_v1  ;;  %v1013_v1 = vld [vmem:[%s1847_s0 + $0x114] sm:$0xf0] }
  0xa2   :  { %v1556_v7 = vadd.f32 %v699_v50, %v611_v6  ;;  %649 = vmatmul.bf16.gmra.mxu1 %v980_v3  ;;  %1155 = vmatmul.msk.bf16.vlgmr.msra.gmra.mxu3 %vm463_vm0, %v1056_v4  ;;  %v1012_v4 = vor.u32 %v1191_v63, %v1011_v62 }
  0xa5   :  { %v1565_v10 = vpop.f32.mrf.mxu3  ;;  %v706_v11 = vpop.f32.mrf.mxu2 }
  0xa6   :  { %v523_v12 = vpop.f32.mrf.mxu0 }
  0xa7   :  { %v612_v14 = vpop.f32.mrf.mxu1 }
  0xa8   :  { %v613_v15 = vadd.f32 %v612_v14, %v523_v12  ;;  %v1043_v12 = vld [vmem:[%s1847_s0 + $0x140] sm:$0xf] }
  0xaa   :  { %v1567_v16 = vadd.f32 %v701_v56, %v613_v15  ;;  %1151 = vmatmul.msk.bf16.gmra.mxu2 %vm463_vm0, %v1008_v13  ;;  %v1198_v13 = vld [vmem:[%s1847_s0 + $0x148] sm:$0xf0] }
  0xab   :  { %v1044_v18 = vor.u32 %v1198_v13, %v1043_v12 }
  0xac   :  { %v1674_v42 = vsel %vm779_vm1, %v1567_v16, -inf }
  0xad   :  { %v1588_v23 = vpop.f32.mrf.mxu3  ;;  %v709_v24 = vpop.f32.mrf.mxu2 }
  0xae   :  { %v526_v26 = vpop.f32.mrf.mxu0 }
  0xaf   :  { %v615_v29 = vpop.f32.mrf.mxu1 }
  0xb0   :  { %v616_v30 = vadd.f32 %v615_v29, %v526_v26  ;;  %v1662_v29 = vsel %vm779_vm1, %v1556_v7, -inf }
  0xb1   :  { %565 = vmatmul.bf16.gmra.mxu0 %v988_v25 }
  0xb2   :  { %v1590_v31 = vadd.f32 %v704_v0, %v616_v30  ;;  %654 = vmatmul.bf16.gmra.mxu1 %v992_v27  ;;  %1156 = vmatmul.msk.bf16.gmra.mxu3 %vm463_vm0, %v1068_v28  ;;  %v1190_v0 = vld [vmem:[%s1847_s0 + $0x10c] sm:$0xf] }
  0xb3   :  { %v1016_v6 = vor.u32 %v1190_v0, %v1013_v1 }
  0xb5   :  { %v1599_v34 = vpop.f32.mrf.mxu3  ;;  %v711_v35 = vpop.f32.mrf.mxu2 }
  0xb6   :  { %v528_v36 = vpop.f32.mrf.mxu0 }
  0xb7   :  { %v617_v38 = vpop.f32.mrf.mxu1 }
  0xb8   :  { %v618_v39 = vadd.f32 %v617_v38, %v528_v36 }
  0xba   :  { %v1601_v40 = vadd.f32 %v706_v11, %v618_v39  ;;  %1152 = vmatmul.msk.bf16.gmra.mxu2 %vm463_vm0, %v1020_v37 }
  0xbc   :  { %v1698_v62 = vsel %vm779_vm1, %v1601_v40, -inf }
  0xbd   :  { %v1616_v45 = vpop.f32.mrf.mxu3  ;;  %v714_v46 = vpop.f32.mrf.mxu2 }
  0xbe   :  { %v531_v48 = vpop.f32.mrf.mxu0 }
  0xbf   :  { %v620_v50 = vpop.f32.mrf.mxu1 }
  0xc0   :  { %v621_v51 = vadd.f32 %v620_v50, %v531_v48 }
  0xc1   :  { %570 = vmatmul.bf16.gmra.mxu0 %v1000_v47 }
  0xc2   :  { %v1618_v52 = vadd.f32 %v709_v24, %v621_v51  ;;  %659 = vmatmul.bf16.gmra.mxu1 %v1004_v49  ;;  %v1686_v51 = vsel %vm779_vm1, %v1590_v31, -inf }
  0xc5   :  { %v1626_v55 = vpop.f32.mrf.mxu3  ;;  %v716_v56 = vpop.f32.mrf.mxu2 }
  0xc6   :  { %v533_v57 = vpop.f32.mrf.mxu0 }
  0xc7   :  { %v622_v59 = vpop.f32.mrf.mxu1 }
  0xc8   :  { %v623_v60 = vadd.f32 %v622_v59, %v533_v57 }
  0xca   :  { %v1628_v61 = vadd.f32 %v711_v35, %v623_v60  ;;  %1153 = vmatmul.msk.bf16.gmra.mxu2 %vm463_vm0, %v1032_v58 }
  0xcd   :  { %v1643_v2 = vpop.f32.mrf.mxu3  ;;  %v719_v3 = vpop.f32.mrf.mxu2 }
  0xce   :  { %v536_v5 = vpop.f32.mrf.mxu0 }
  0xcf   :  { %v625_v8 = vpop.f32.mrf.mxu1 }
  0xd0   :  { %v626_v9 = vadd.f32 %v625_v8, %v536_v5  ;;  %v808_v8 = vsel %vm779_vm1, %v1618_v52, -inf }
  0xd1   :  { %575 = vmatmul.bf16.gmra.mxu0 %v1012_v4 }
  0xd2   :  { %v1645_v11 = vadd.f32 %v714_v46, %v626_v9  ;;  %664 = vmatmul.bf16.gmra.mxu1 %v1016_v6 }
  0xd5   :  { %v1653_v14 = vpop.f32.mrf.mxu3  ;;  %v721_v15 = vpop.f32.mrf.mxu2 }
  0xd6   :  { %v538_v17 = vpop.f32.mrf.mxu0 }
  0xd7   :  { %v627_v19 = vpop.f32.mrf.mxu1 }
  0xd8   :  { %v628_v20 = vadd.f32 %v627_v19, %v538_v17  ;;  %v1713_v19 = vsel %vm779_vm1, %v1628_v61, -inf }
  0xda   :  { %v1655_v21 = vadd.f32 %v716_v56, %v628_v20  ;;  %1154 = vmatmul.msk.bf16.gmra.mxu2 %vm463_vm0, %v1044_v18 }
  0xdd   :  { %v1658_v22 = vpop.f32.mrf.mxu3  ;;  %v724_v24 = vpop.f32.mrf.mxu2 }
  0xde   :  { %v541_v25 = vpop.f32.mrf.mxu0 }
  0xdf   :  { %v630_v26 = vpop.f32.mrf.mxu1 }
  0xe0   :  { %v631_v27 = vadd.f32 %v630_v26, %v541_v25 }
  0xe2   :  { %v720_v28 = vadd.f32 %v719_v3, %v631_v27 }
  0xe4   :  { %v1665_v30 = vsel %vm779_vm1, %v720_v28, -inf }
  0xe5   :  { %v782_v32 = vmax.f32 %v1662_v29, %v1665_v30  ;;  %v670_v33 = vpop.f32.mrf.mxu3  ;;  %v726_v35 = vpop.f32.mrf.mxu2 }
  0xe6   :  { %v1670_v36 = vadd.f32 %v670_v33, %v1565_v10  ;;  %v543_v37 = vpop.f32.mrf.mxu0  ;;  %v1722_v33 = vsel %vm779_vm1, %v1645_v11, -inf }
  0xe7   :  { %v632_v38 = vpop.f32.mrf.mxu1 }
  0xe8   :  { %v633_v39 = vadd.f32 %v632_v38, %v543_v37 }
  0xea   :  { %v722_v41 = vadd.f32 %v721_v15, %v633_v39 }
  0xec   :  { %v1677_v7 = vsel %vm779_vm1, %v722_v41, -inf }
  0xed   :  { %v789_v43 = vmax.f32 %v1674_v42, %v1677_v7  ;;  %v672_v44 = vpop.f32.mrf.mxu3  ;;  %v729_v46 = vpop.f32.mrf.mxu2 }
  0xee   :  { %v1682_v47 = vadd.f32 %v672_v44, %v1588_v23  ;;  %v546_v10 = vpop.f32.mrf.mxu0 }
  0xef   :  { %v635_v48 = vpop.f32.mrf.mxu1 }
  0xf0   :  { %v636_v49 = vadd.f32 %v635_v48, %v546_v10  ;;  %v1733_v10 = vsel %vm779_vm1, %v1655_v21, -inf }
  0xf2   :  { %v725_v50 = vadd.f32 %v724_v24, %v636_v49 }
  0xf4   :  { %v1689_v16 = vsel %vm779_vm1, %v725_v50, -inf }
  0xf5   :  { %v675_v54 = vpop.f32.mrf.mxu3  ;;  %v731_v56 = vpop.f32.mrf.mxu2 }
  0xf6   :  { %v1694_v57 = vadd.f32 %v675_v54, %v1599_v34  ;;  %v548_v23 = vpop.f32.mrf.mxu0 }
  0xf7   :  { %v637_v58 = vpop.f32.mrf.mxu1 }
  0xf8   :  { %v638_v59 = vadd.f32 %v637_v58, %v548_v23 }
  0xfa   :  { %v727_v60 = vadd.f32 %v726_v35, %v638_v59 }
  0xfc   :  { %v1701_v31 = vsel %vm779_vm1, %v727_v60, -inf }
  0xfd   :  { %v677_v0 = vpop.f32.mrf.mxu3  ;;  %v734_v1 = vpop.f32.mrf.mxu2 }
  0xfe   :  { %v1706_v3 = vadd.f32 %v677_v0, %v1616_v45  ;;  %v551_v34 = vpop.f32.mrf.mxu0 }
  0xff   :  { %v640_v4 = vpop.f32.mrf.mxu1 }
 0x100   :  { %v641_v5 = vadd.f32 %v640_v4, %v551_v34 }
 0x102   :  { %v730_v6 = vadd.f32 %v729_v46, %v641_v5 }
 0x104   :  { %v809_v40 = vsel %vm779_vm1, %v730_v6, -inf }
 0x105   :  { %v810_v9 = vmax.f32 %v808_v8, %v809_v40  ;;  %v736_v12 = vpop.f32.mrf.mxu2  ;;  %v680_v27 = vpop.f32.mrf.mxu3 }
 0x106   :  { %v553_v13 = vpop.f32.mrf.mxu0 }
 0x107   :  { %v642_v15 = vpop.f32.mrf.mxu1 }
 0x108   :  { %v643_v17 = vadd.f32 %v642_v15, %v553_v13  ;;  %v681_v13 = vadd.f32 %v680_v27, %v1626_v55 }
 0x10a   :  { %v732_v18 = vadd.f32 %v731_v56, %v643_v17 }
 0x10c   :  { %v1716_v45 = vsel %vm779_vm1, %v732_v18, -inf }
 0x10d   :  { %v817_v20 = vmax.f32 %v1713_v19, %v1716_v45  ;;  %v739_v24 = vpop.f32.mrf.mxu2  ;;  %v682_v46 = vpop.f32.mrf.mxu3 }
 0x10e   :  { %v556_v52 = vpop.f32.mrf.mxu0  ;;  %v683_v55 = vadd.f32 %v682_v46, %v1643_v2 }
 0x10f   :  { %v645_v25 = vpop.f32.mrf.mxu1 }
 0x110   :  { %v646_v26 = vadd.f32 %v645_v25, %v556_v52 }
 0x112   :  { %v735_v28 = vadd.f32 %v734_v1, %v646_v26 }
 0x114   :  { %v1725_v35 = vsel %vm779_vm1, %v735_v28, -inf }
 0x115   :  { %v824_v61 = vmax.f32 %v1722_v33, %v1725_v35  ;;  %v1729_v37 = vpop.f32.mrf.mxu2  ;;  %v685_v56 = vpop.f32.mrf.mxu3 }
 0x116   :  { %v558_v38 = vpop.f32.mrf.mxu0  ;;  %v686_v19 = vadd.f32 %v685_v56, %v1653_v14 }
 0x117   :  { %v647_v39 = vpop.f32.mrf.mxu1 }
 0x118   :  { %v648_v41 = vadd.f32 %v647_v39, %v558_v38  ;;  %v1755_v38 = vld [vmem:[%s1848_s2] ss:$0 sm:$0xff] }
 0x11a   :  { %v737_v44 = vadd.f32 %v736_v12, %v648_v41 }
 0x11c   :  { %v1736_v11 = vsel %vm779_vm1, %v737_v44, -inf }
 0x11d   :  { %v831_v48 = vmax.f32 %v1733_v10, %v1736_v11  ;;  %v1740_v49 = vpop.f32.mrf.mxu2  ;;  %v1744_v1 = vpop.f32.mrf.mxu3 }
 0x11e   :  { %v561_v50 = vpop.f32.mrf.mxu0  ;;  %v688_v35 = vadd.f32 %v1744_v1, %v1658_v22 }
 0x11f   :  { %v650_v54 = vpop.f32.mrf.mxu1 }
 0x120   :  { %v651_v25 = vadd.f32 %v650_v54, %v561_v50 }
 0x122   :  { %v740_v27 = vadd.f32 %v739_v24, %v651_v25 }
 0x125   :  { %v1742_v23 = vpop.f32.mrf.mxu2  ;;  %v769_v6 = vpop.f32.mrf.mxu3 }
 0x126   :  { %v563_v58 = vpop.f32.mrf.mxu0  ;;  %v770_v17 = vadd.f32 %v769_v6, %v681_v13 }
 0x127   :  { %v652_v59 = vpop.f32.mrf.mxu1 }
 0x128   :  { %v813_v41 = vsel %vm779_vm1, %v770_v17, -inf }
 0x12d   :  { %v749_v60 = vpop.f32.mrf.mxu2  ;;  %v771_v52 = vpop.f32.mrf.mxu3 }
 0x12e   :  { %v566_v0 = vpop.f32.mrf.mxu0  ;;  %v772_v54 = vadd.f32 %v771_v52, %v683_v55 }
 0x12f   :  { %v655_v21 = vpop.f32.mrf.mxu1 }
 0x130   :  { %v656_v29 = vadd.f32 %v655_v21, %v566_v0 }
 0x135   :  { %v751_v34 = vpop.f32.mrf.mxu2 }
 0x136   :  { %v1746_v4 = vpop.f32.mrf.mxu0 }
 0x137   :  { %v1748_v5 = vpop.f32.mrf.mxu1 }
 0x13d   :  { %v754_v8 = vpop.f32.mrf.mxu2 }
 0x13e   :  { %v571_v40 = vpop.f32.mrf.mxu0 }
 0x13f   :  { %v660_v12 = vpop.f32.mrf.mxu1 }
 0x140   :  { %v661_v15 = vadd.f32 %v660_v12, %v571_v40  ;;  %v783_v40 = vsel %vm779_vm1, %v740_v27, -inf  ;;  %v653_v12 = vadd.f32 %v652_v59, %v563_v58 }
 0x141   :  { %v784_v58 = vmax.f32 %v782_v32, %v783_v40 }
 0x142   :  { %v750_v18 = vadd.f32 %v749_v60, %v661_v15  ;;  %v774_v15 = vpop.f32.mrf.mxu3  ;;  %v742_v45 = vadd.f32 %v1729_v37, %v653_v12 }
 0x143   :  { %v775_v25 = vadd.f32 %v774_v15, %v686_v19  ;;  %v1851_v19 = vmax.f32 %v1698_v62, %v1701_v31 }
 0x144   :  { %v811_v26 = vsel %vm779_vm1, %v750_v18, -inf }
 0x145   :  { %v812_v28 = vmax.f32 %v810_v9, %v811_v26  ;;  %v756_v39 = vpop.f32.mrf.mxu2  ;;  %v827_v55 = vsel %vm779_vm1, %v775_v25, -inf }
 0x146   :  { %v573_v44 = vpop.f32.mrf.mxu0 }
 0x147   :  { %v814_v63 = vmax.f32 %v812_v28, %v813_v41  ;;  %v662_v53 = vpop.f32.mrf.mxu1 }
 0x148   :  { %v663_v60 = vadd.f32 %v662_v53, %v573_v44  ;;  %v820_v53 = vsel %vm779_vm1, %v772_v54, -inf  ;;  %v790_v44 = vsel %vm779_vm1, %v742_v45, -inf }
 0x149   :  { %v844_v50 = vadd.f32 %v1755_v38, %v814_v63 }
 0x14a   :  { %v752_v6 = vadd.f32 %v751_v34, %v663_v60  ;;  %v776_v60 = vpop.f32.mrf.mxu3 }
 0x14b   :  { %v852_v9 = vmax.f32 %v844_v50, 0.0  ;;  %v791_v50 = vmax.f32 %v789_v43, %v790_v44  ;;  %v777_v40 = vadd.f32 %v776_v60, %v688_v35 }
 0x14c   :  { %v818_v13 = vsel %vm779_vm1, %v752_v6, -inf }
 0x14d   :  { %v860_v17 = vpack.c.bf16 %v852_v9, %v852_v9  ;;  %v819_v18 = vmax.f32 %v817_v20, %v818_v13  ;;  %v759_v2 = vpop.f32.mrf.mxu2 }
 0x14e   :  { %v760_v63 = vadd.f32 %v759_v2, %v1670_v36  ;;  %v576_v24 = vpop.f32.mrf.mxu0 }
 0x14f   :  { %869 = vst.msk [vmem:[%s1849_s3 + $0x10] sm:$0xf] %vm864_vm2, %v860_v17  ;;  %v821_v46 = vmax.f32 %v819_v18, %v820_v53  ;;  %v665_v59 = vpop.f32.mrf.mxu1  ;;  %v834_v18 = vsel %vm779_vm1, %v777_v40, -inf }
 0x150   :  { %v785_v20 = vsel %vm779_vm1, %v760_v63, -inf  ;;  %v666_v34 = vadd.f32 %v665_v59, %v576_v24 }
 0x151   :  { %v845_v36 = vadd.f32 %v1755_v38, %v821_v46  ;;  %v786_v52 = vmax.f32 %v784_v58, %v785_v20 }
 0x152   :  { %v755_v26 = vadd.f32 %v754_v8, %v666_v34 }
 0x153   :  { %v853_v28 = vmax.f32 %v845_v36, 0.0  ;;  %v840_v41 = vadd.f32 %v1755_v38, %v786_v52 }
 0x154   :  { %v825_v30 = vsel %vm779_vm1, %v755_v26, -inf }
 0x155   :  { %v861_v32 = vpack.c.bf16 %v853_v28, %v853_v28  ;;  %v848_v14 = vmax.f32 %v840_v41, 0.0  ;;  %v826_v37 = vmax.f32 %v824_v61, %v825_v30  ;;  %v761_v56 = vpop.f32.mrf.mxu2  ;;  %v745_v61 = vadd.f32 %v1740_v49, %v656_v29 }
 0x156   :  { %v762_v27 = vadd.f32 %v761_v56, %v1682_v47  ;;  %v578_v8 = vpop.f32.mrf.mxu0  ;;  %v658_v49 = vadd.f32 %v1748_v5, %v1746_v4  ;;  %v1850_v5 = vmax.f32 %v1686_v51, %v1689_v16 }
 0x157   :  { %870 = vst.msk [vmem:[%s1849_s3 + $0x14] sm:$0xf] %vm864_vm2, %v861_v32  ;;  %v856_v0 = vpack.c.bf16 %v848_v14, %v848_v14  ;;  %v828_v21 = vmax.f32 %v826_v37, %v827_v55  ;;  %v667_v33 = vpop.f32.mrf.mxu1  ;;  %v797_v22 = vsel %vm779_vm1, %v745_v61, -inf }
 0x158   :  { %v792_v47 = vsel %vm779_vm1, %v762_v27, -inf  ;;  %v668_v54 = vadd.f32 %v667_v33, %v578_v8  ;;  %v798_v53 = vmax.f32 %v1850_v5, %v797_v22  ;;  %v747_v63 = vadd.f32 %v1742_v23, %v658_v49 }
 0x159   :  { %865 = vst.msk [vmem:[%s1849_s3] sm:$0xf] %vm864_vm2, %v856_v0  ;;  %v846_v6 = vadd.f32 %v1755_v38, %v828_v21  ;;  %v793_v9 = vmax.f32 %v791_v50, %v792_v47 }
 0x15a   :  { %v757_v42 = vadd.f32 %v756_v39, %v668_v54  ;;  %v804_v46 = vsel %vm779_vm1, %v747_v63, -inf }
 0x15b   :  { %v854_v7 = vmax.f32 %v846_v6, 0.0  ;;  %v841_v43 = vadd.f32 %v1755_v38, %v793_v9  ;;  %v805_v45 = vmax.f32 %v1851_v19, %v804_v46 }
 0x15c   :  { %v832_v1 = vsel %vm779_vm1, %v757_v42, -inf }
 0x15d   :  { %v862_v12 = vpack.c.bf16 %v854_v7, %v854_v7  ;;  %v849_v13 = vmax.f32 %v841_v43, 0.0  ;;  %v833_v15 = vmax.f32 %v831_v48, %v832_v1  ;;  %v764_v17 = vpop.f32.mrf.mxu2 }
 0x15e   :  { %v765_v39 = vadd.f32 %v764_v17, %v1694_v57 }
 0x15f   :  { %871 = vst.msk [vmem:[%s1849_s3 + $0x18] sm:$0xf] %vm864_vm2, %v862_v12  ;;  %v857_v2 = vpack.c.bf16 %v849_v13, %v849_v13  ;;  %v835_v4 = vmax.f32 %v833_v15, %v834_v18 }
 0x160   :  { %v799_v10 = vsel %vm779_vm1, %v765_v39, -inf }
 0x161   :  { %866 = vst.msk [vmem:[%s1849_s3 + $0x4] sm:$0xf] %vm864_vm2, %v857_v2  ;;  %v847_v57 = vadd.f32 %v1755_v38, %v835_v4  ;;  %v800_v11 = vmax.f32 %v798_v53, %v799_v10 }
 0x163   :  { %v855_v48 = vmax.f32 %v847_v57, 0.0  ;;  %v842_v24 = vadd.f32 %v1755_v38, %v800_v11 }
 0x165   :  { %v863_v58 = vpack.c.bf16 %v855_v48, %v855_v48  ;;  %v850_v51 = vmax.f32 %v842_v24, 0.0  ;;  %v766_v16 = vpop.f32.mrf.mxu2 }
 0x166   :  { %v767_v23 = vadd.f32 %v766_v16, %v1706_v3 }
 0x167   :  { %872 = vst.msk [vmem:[%s1849_s3 + $0x1c] sm:$0xf] %vm864_vm2, %v863_v58  ;;  %v858_v59 = vpack.c.bf16 %v850_v51, %v850_v51 }
 0x168   :  { %v806_v20 = vsel %vm779_vm1, %v767_v23, -inf }
 0x169   :  { %867 = vst.msk [vmem:[%s1849_s3 + $0x8] sm:$0xf] %vm864_vm2, %v858_v59  ;;  %v807_v34 = vmax.f32 %v805_v45, %v806_v20 }
 0x16b   :  { %v843_v3 = vadd.f32 %v1755_v38, %v807_v34 }
 0x16d   :  { %v851_v36 = vmax.f32 %v843_v3, 0.0 }
 0x16f   :  { %v859_v52 = vpack.c.bf16 %v851_v36, %v851_v36 }
 0x171   :  { %868 = vst.msk [vmem:[%s1849_s3 + $0xc] sm:$0xf] %vm864_vm2, %v859_v52 }

// kernel: digit_cnn_forward.5
= control target key start
LH: loop header
LB: loop body
LE: loop exit
PB: predicated region body
PF: predicated region fallthrough
CT: control target
= control target key end

     0   :  { %vm904_vm0 = vcmask 523264   ;;  %vm1175_vm1 = vcmask 80896   ;;  %s2274_s1 = inlined_call_operand.vmem [shape: bf16[1600,128], index: 1, kind: input, shape index: {}]   ;;  %s2275_s2 = inlined_call_operand.vmem [shape: f32[1,128], index: 2, kind: input, shape index: {}]   ;;  %s2276_s0 = inlined_call_operand.vmem [shape: bf16[16,1600], index: 0, kind: input, shape index: {}]   ;;  %s2277_s4 = inlined_call_operand.vmem [shape: f32[1,10], index: 4, kind: input, shape index: {}]   ;;  %s2278_s3 = inlined_call_operand.vmem [shape: bf16[128,10], index: 3, kind: input, shape index: {}]   ;;  %s2279_s5 = inlined_call_operand.vmem [shape: f32[16,10], index: 5, kind: output, shape index: {}]  }
   0x1   :  { %v1713_v0 = vld [vmem:[%s2274_s1 + $0x38] sm:$0xff]  ;;  %v1712_v4 = vld [vmem:[%s2274_s1 + $0x30] sm:$0xff]  ;;  %v1711_v8 = vld [vmem:[%s2274_s1 + $0x28] sm:$0xff] }
   0x2   :  { %v1729_v1 = vld [vmem:[%s2274_s1 + $0xb8] sm:$0xff]  ;;  %908 = vmatpush.bf16.msra.mxu0 %v1713_v0  ;;  %v1728_v5 = vld [vmem:[%s2274_s1 + $0xb0] sm:$0xff]  ;;  %v1727_v9 = vld [vmem:[%s2274_s1 + $0xa8] sm:$0xff] }
   0x3   :  { %v1737_v2 = vld [vmem:[%s2274_s1 + $0xf8] sm:$0xff]  ;;  %936 = vmatpush.bf16.msra.mxu2 %v1729_v1  ;;  %v1736_v6 = vld [vmem:[%s2274_s1 + $0xf0] sm:$0xff]  ;;  %v1735_v10 = vld [vmem:[%s2274_s1 + $0xe8] sm:$0xff] }
   0x4   :  { %v1721_v3 = vld [vmem:[%s2274_s1 + $0x78] sm:$0xff]  ;;  %950 = vmatpush.bf16.msra.mxu3 %v1737_v2  ;;  %v1720_v7 = vld [vmem:[%s2274_s1 + $0x70] sm:$0xff]  ;;  %v1719_v11 = vld [vmem:[%s2274_s1 + $0x68] sm:$0xff] }
   0x5   :  { %922 = vmatpush.bf16.msra.mxu1 %v1721_v3  ;;  %v1710_v12 = vld [vmem:[%s2274_s1 + $0x20] sm:$0xff]  ;;  %v1709_v16 = vld [vmem:[%s2274_s1 + $0x18] sm:$0xff]  ;;  %v1708_v20 = vld [vmem:[%s2274_s1 + $0x10] sm:$0xff] }
   0x6   :  { %909 = vmatpush.bf16.msra.mxu0 %v1712_v4  ;;  %v1726_v13 = vld [vmem:[%s2274_s1 + $0xa0] sm:$0xff]  ;;  %v1725_v17 = vld [vmem:[%s2274_s1 + $0x98] sm:$0xff]  ;;  %v1724_v21 = vld [vmem:[%s2274_s1 + $0x90] sm:$0xff] }
   0x7   :  { %937 = vmatpush.bf16.msra.mxu2 %v1728_v5  ;;  %v1734_v14 = vld [vmem:[%s2274_s1 + $0xe0] sm:$0xff]  ;;  %v1733_v18 = vld [vmem:[%s2274_s1 + $0xd8] sm:$0xff]  ;;  %v1732_v22 = vld [vmem:[%s2274_s1 + $0xd0] sm:$0xff] }
   0x8   :  { %951 = vmatpush.bf16.msra.mxu3 %v1736_v6  ;;  %v1718_v15 = vld [vmem:[%s2274_s1 + $0x60] sm:$0xff]  ;;  %v1717_v19 = vld [vmem:[%s2274_s1 + $0x58] sm:$0xff]  ;;  %v1716_v23 = vld [vmem:[%s2274_s1 + $0x50] sm:$0xff] }
   0x9   :  { %923 = vmatpush.bf16.msra.mxu1 %v1720_v7  ;;  %v1707_v24 = vld [vmem:[%s2274_s1 + $0x8] sm:$0xff]  ;;  %v1706_v28 = vld [vmem:[%s2274_s1] sm:$0xff]  ;;  %v1745_v31 = vld [vmem:[%s2274_s1 + $0x138] sm:$0xff] }
   0xa   :  { %910 = vmatpush.bf16.msra.mxu0 %v1711_v8  ;;  %v1723_v25 = vld [vmem:[%s2274_s1 + $0x88] sm:$0xff]  ;;  %v1722_v29 = vld [vmem:[%s2274_s1 + $0x80] sm:$0xff]  ;;  %v1699_v33 = vld [vmem:[%s2276_s0 + $0x30] sm:$0xf0] }
   0xb   :  { %938 = vmatpush.bf16.msra.mxu2 %v1727_v9  ;;  %v1731_v26 = vld [vmem:[%s2274_s1 + $0xc8] sm:$0xff]  ;;  %v1730_v30 = vld [vmem:[%s2274_s1 + $0xc0] sm:$0xff]  ;;  %v1761_v34 = vld [vmem:[%s2274_s1 + $0x1b8] sm:$0xff] }
   0xc   :  { %952 = vmatpush.bf16.msra.mxu3 %v1735_v10  ;;  %v1715_v27 = vld [vmem:[%s2274_s1 + $0x48] sm:$0xff]  ;;  %v1210_v32 = vld [vmem:[%s2276_s0] sm:$0xf]  ;;  %v1700_v36 = vld [vmem:[%s2276_s0 + $0x38] sm:$0xf0] }
   0xd   :  { %924 = vmatpush.bf16.msra.mxu1 %v1719_v11  ;;  %v1218_v35 = vld [vmem:[%s2276_s0 + $0x8] sm:$0xf]  ;;  %v1769_v37 = vld [vmem:[%s2274_s1 + $0x1f8] sm:$0xff]  ;;  %v1694_v38 = vld [vmem:[%s2276_s0 + $0xc] sm:$0xf]  ;;  %v1211_v41 = vor.u32 %v1699_v33, %v1210_v32 }
   0xe   :  { %911 = vmatpush.bf16.msra.mxu0 %v1710_v12  ;;  %v1220_v39 = vld [vmem:[%s2276_s0 + $0x3c] sm:$0xf0]  ;;  %v1753_v42 = vld [vmem:[%s2274_s1 + $0x178] sm:$0xff]  ;;  %v1219_v43 = vor.u32 %v1700_v36, %v1218_v35  ;;  %v1693_v44 = vld [vmem:[%s2276_s0 + $0x4] sm:$0xf] }
   0xf   :  { %939 = vmatpush.bf16.msra.mxu2 %v1726_v13  ;;  %v1714_v40 = vld [vmem:[%s2274_s1 + $0x40] sm:$0xff]  ;;  %v1212_v45 = vld [vmem:[%s2276_s0 + $0x34] sm:$0xf0]  ;;  %v1744_v46 = vld [vmem:[%s2274_s1 + $0x130] sm:$0xff]  ;;  %v1223_v47 = vor.u32 %v1694_v38, %v1220_v39 }
  0x10   :  { %953 = vmatpush.bf16.msra.mxu3 %v1734_v14  ;;  %v1760_v48 = vld [vmem:[%s2274_s1 + $0x1b0] sm:$0xff]  ;;  %v1215_v50 = vor.u32 %v1693_v44, %v1212_v45  ;;  %v1743_v52 = vld [vmem:[%s2274_s1 + $0x128] sm:$0xff]  ;;  %v1742_v56 = vld [vmem:[%s2274_s1 + $0x120] sm:$0xff] }
  0x11   :  { %925 = vmatpush.bf16.msra.mxu1 %v1718_v15  ;;  %v1768_v49 = vld [vmem:[%s2274_s1 + $0x1f0] sm:$0xff]  ;;  %v1759_v53 = vld [vmem:[%s2274_s1 + $0x1a8] sm:$0xff]  ;;  %v1758_v57 = vld [vmem:[%s2274_s1 + $0x1a0] sm:$0xff] }
  0x12   :  { %912 = vmatpush.bf16.msra.mxu0 %v1709_v16  ;;  %v1752_v51 = vld [vmem:[%s2274_s1 + $0x170] sm:$0xff]  ;;  %v1767_v54 = vld [vmem:[%s2274_s1 + $0x1e8] sm:$0xff]  ;;  %v1766_v58 = vld [vmem:[%s2274_s1 + $0x1e0] sm:$0xff] }
  0x13   :  { %940 = vmatpush.bf16.msra.mxu2 %v1725_v17  ;;  %v1751_v55 = vld [vmem:[%s2274_s1 + $0x168] sm:$0xff]  ;;  %v1750_v59 = vld [vmem:[%s2274_s1 + $0x160] sm:$0xff]  ;;  %v1741_v60 = vld [vmem:[%s2274_s1 + $0x118] sm:$0xff] }
  0x14   :  { %954 = vmatpush.bf16.msra.mxu3 %v1733_v18  ;;  %v1757_v61 = vld [vmem:[%s2274_s1 + $0x198] sm:$0xff]  ;;  %v1740_v0 = vld [vmem:[%s2274_s1 + $0x110] sm:$0xff]  ;;  %v1739_v4 = vld [vmem:[%s2274_s1 + $0x108] sm:$0xff] }
  0x15   :  { %926 = vmatpush.bf16.msra.mxu1 %v1717_v19  ;;  %v1765_v62 = vld [vmem:[%s2274_s1 + $0x1d8] sm:$0xff]  ;;  %v1756_v1 = vld [vmem:[%s2274_s1 + $0x190] sm:$0xff]  ;;  %v1755_v5 = vld [vmem:[%s2274_s1 + $0x188] sm:$0xff] }
  0x16   :  { %913 = vmatpush.bf16.msra.mxu0 %v1708_v20  ;;  %v1749_v63 = vld [vmem:[%s2274_s1 + $0x158] sm:$0xff]  ;;  %v1764_v2 = vld [vmem:[%s2274_s1 + $0x1d0] sm:$0xff]  ;;  %v1763_v6 = vld [vmem:[%s2274_s1 + $0x1c8] sm:$0xff] }
  0x17   :  { %941 = vmatpush.bf16.msra.mxu2 %v1724_v21  ;;  %v1748_v3 = vld [vmem:[%s2274_s1 + $0x150] sm:$0xff]  ;;  %v1747_v7 = vld [vmem:[%s2274_s1 + $0x148] sm:$0xff]  ;;  %v1738_v8 = vld [vmem:[%s2274_s1 + $0x100] sm:$0xff] }
  0x18   :  { %955 = vmatpush.bf16.msra.mxu3 %v1732_v22  ;;  %v1754_v9 = vld [vmem:[%s2274_s1 + $0x180] sm:$0xff]  ;;  %v1777_v11 = vld [vmem:[%s2274_s1 + $0x238] sm:$0xff]  ;;  %v1226_v13 = vld [vmem:[%s2276_s0 + $0x10] sm:$0xf] }
  0x19   :  { %927 = vmatpush.bf16.msra.mxu1 %v1716_v23  ;;  %v1762_v10 = vld [vmem:[%s2274_s1 + $0x1c0] sm:$0xff]  ;;  %v1793_v12 = vld [vmem:[%s2274_s1 + $0x2b8] sm:$0xff]  ;;  %v1702_v16 = vld [vmem:[%s2276_s0 + $0x48] sm:$0xf0] }
  0x1a   :  { %914 = vmatpush.bf16.msra.mxu0 %v1707_v24  ;;  %v1701_v14 = vld [vmem:[%s2276_s0 + $0x40] sm:$0xf0]  ;;  %v1234_v15 = vld [vmem:[%s2276_s0 + $0x18] sm:$0xf]  ;;  %v1696_v18 = vld [vmem:[%s2276_s0 + $0x1c] sm:$0xf] }
  0x1b   :  { %942 = vmatpush.bf16.msra.mxu2 %v1723_v25  ;;  %v1801_v17 = vld [vmem:[%s2274_s1 + $0x2f8] sm:$0xff]  ;;  %v1236_v19 = vld [vmem:[%s2276_s0 + $0x4c] sm:$0xf0]  ;;  %v1746_v20 = vld [vmem:[%s2274_s1 + $0x140] sm:$0xff]  ;;  %v1227_v23 = vor.u32 %v1701_v14, %v1226_v13  ;;  %v1235_v24 = vor.u32 %v1702_v16, %v1234_v15 }
  0x1c   :  { %956 = vmatpush.bf16.msra.mxu3 %v1731_v26  ;;  %v1695_v21 = vld [vmem:[%s2276_s0 + $0x14] sm:$0xf]  ;;  %v1228_v22 = vld [vmem:[%s2276_s0 + $0x44] sm:$0xf0]  ;;  %v1785_v25 = vld [vmem:[%s2274_s1 + $0x278] sm:$0xff]  ;;  %v1239_v26 = vor.u32 %v1696_v18, %v1236_v19 }
  0x1d   :  { %928 = vmatpush.bf16.msra.mxu1 %v1715_v27  ;;  %v1231_v27 = vor.u32 %v1695_v21, %v1228_v22  ;;  %v1775_v32 = vld [vmem:[%s2274_s1 + $0x228] sm:$0xff]  ;;  %v1774_v36 = vld [vmem:[%s2274_s1 + $0x220] sm:$0xff]  ;;  %v1772_v44 = vld [vmem:[%s2274_s1 + $0x210] sm:$0xff] }
  0x1e   :  { %915 = vmatpush.bf16.msra.mxu0 %v1706_v28  ;;  %v1776_v28 = vld [vmem:[%s2274_s1 + $0x230] sm:$0xff]  ;;  %v1791_v33 = vld [vmem:[%s2274_s1 + $0x2a8] sm:$0xff]  ;;  %v1798_v38 = vld [vmem:[%s2274_s1 + $0x2e0] sm:$0xff] }
  0x1f   :  { %943 = vmatpush.bf16.msra.mxu2 %v1722_v29  ;;  %v1792_v29 = vld [vmem:[%s2274_s1 + $0x2b0] sm:$0xff]  ;;  %v1783_v35 = vld [vmem:[%s2274_s1 + $0x268] sm:$0xff]  ;;  %v1782_v39 = vld [vmem:[%s2274_s1 + $0x260] sm:$0xff] }
  0x20   :  { %957 = vmatpush.bf16.msra.mxu3 %v1730_v30  ;;  %v1800_v30 = vld [vmem:[%s2274_s1 + $0x2f0] sm:$0xff]  ;;  %v1813_v13 = vld [vmem:[%s2278_s3 + $0x38] sm:$0xff]  ;;  %v1811_v18 = vld [vmem:[%s2278_s3 + $0x28] sm:$0xff] }
  0x21   :  { %929 = vmatpush.bf16.msra.mxu1 %v1714_v40  ;;  %916 = vmatmul.bf16.vlgmr.msra.gmra.mxu0 %v1211_v41  ;;  %v1773_v40 = vld [vmem:[%s2274_s1 + $0x218] sm:$0xff]  ;;  %v1788_v45 = vld [vmem:[%s2274_s1 + $0x290] sm:$0xff]  ;;  %v1810_v22 = vld [vmem:[%s2278_s3 + $0x20] sm:$0xff] }
  0x22   :  { %964 = vmatpush.bf16.msrb.mxu0 %v1745_v31  ;;  %944 = vmatmul.bf16.vlgmr.msra.gmra.mxu2 %v1219_v43  ;;  %v1784_v31 = vld [vmem:[%s2274_s1 + $0x270] sm:$0xff]  ;;  %v1789_v41 = vld [vmem:[%s2274_s1 + $0x298] sm:$0xff] }
  0x23   :  { %992 = vmatpush.bf16.msrb.mxu2 %v1761_v34  ;;  %958 = vmatmul.bf16.vlgmr.msra.gmra.mxu3 %v1223_v47  ;;  %v1799_v34 = vld [vmem:[%s2274_s1 + $0x2e8] sm:$0xff]  ;;  %v1781_v43 = vld [vmem:[%s2274_s1 + $0x258] sm:$0xff]  ;;  %v1780_v47 = vld [vmem:[%s2274_s1 + $0x250] sm:$0xff] }
  0x24   :  { %1006 = vmatpush.bf16.msrb.mxu3 %v1769_v37  ;;  %930 = vmatmul.bf16.vlgmr.msra.gmra.mxu1 %v1215_v50  ;;  %v1790_v37 = vld [vmem:[%s2274_s1 + $0x2a0] sm:$0xff]  ;;  %v1795_v50 = vld [vmem:[%s2274_s1 + $0x2c8] sm:$0xff]  ;;  %v1812_v15 = vld [vmem:[%s2278_s3 + $0x30] sm:$0xff] }
  0x25   :  { %978 = vmatpush.bf16.msrb.mxu1 %v1753_v42  ;;  %v1797_v42 = vld [vmem:[%s2274_s1 + $0x2d8] sm:$0xff] }
  0x26   :  { %965 = vmatpush.bf16.msrb.mxu0 %v1744_v46  ;;  %v1796_v46 = vld [vmem:[%s2274_s1 + $0x2d0] sm:$0xff] }
  0x27   :  { %993 = vmatpush.bf16.msrb.mxu2 %v1760_v48  ;;  %v1771_v48 = vld [vmem:[%s2274_s1 + $0x208] sm:$0xff] }
  0x28   :  { %1007 = vmatpush.bf16.msrb.mxu3 %v1768_v49  ;;  %v1787_v49 = vld [vmem:[%s2274_s1 + $0x288] sm:$0xff] }
  0x29   :  { %979 = vmatpush.bf16.msrb.mxu1 %v1752_v51  ;;  %v1779_v51 = vld [vmem:[%s2274_s1 + $0x248] sm:$0xff] }
  0x2a   :  { %966 = vmatpush.bf16.msrb.mxu0 %v1743_v52  ;;  %v1770_v52 = vld [vmem:[%s2274_s1 + $0x200] sm:$0xff] }
  0x2b   :  { %994 = vmatpush.bf16.msrb.mxu2 %v1759_v53  ;;  %v1786_v53 = vld [vmem:[%s2274_s1 + $0x280] sm:$0xff] }
  0x2c   :  { %1008 = vmatpush.bf16.msrb.mxu3 %v1767_v54  ;;  %v1794_v54 = vld [vmem:[%s2274_s1 + $0x2c0] sm:$0xff] }
  0x2d   :  { %980 = vmatpush.bf16.msrb.mxu1 %v1751_v55  ;;  %v1242_v55 = vld [vmem:[%s2276_s0 + $0x20] sm:$0xf] }
  0x2e   :  { %967 = vmatpush.bf16.msrb.mxu0 %v1742_v56  ;;  %v1703_v56 = vld [vmem:[%s2276_s0 + $0x50] sm:$0xf0] }
  0x2f   :  { %995 = vmatpush.bf16.msrb.mxu2 %v1758_v57  ;;  %v1250_v57 = vld [vmem:[%s2276_s0 + $0x28] sm:$0xf] }
  0x30   :  { %1009 = vmatpush.bf16.msrb.mxu3 %v1766_v58  ;;  %v1704_v58 = vld [vmem:[%s2276_s0 + $0x58] sm:$0xf0] }
  0x31   :  { %981 = vmatpush.bf16.msrb.mxu1 %v1750_v59  ;;  %v1698_v59 = vld [vmem:[%s2276_s0 + $0x2c] sm:$0xf] }
  0x32   :  { %968 = vmatpush.bf16.msrb.mxu0 %v1741_v60  ;;  %v1252_v60 = vld [vmem:[%s2276_s0 + $0x5c] sm:$0xf0] }
  0x33   :  { %996 = vmatpush.bf16.msrb.mxu2 %v1757_v61  ;;  %v1805_v61 = vld [vmem:[%s2274_s1 + $0x318] sm:$0xff] }
  0x34   :  { %1010 = vmatpush.bf16.msrb.mxu3 %v1765_v62  ;;  %v1778_v62 = vld [vmem:[%s2274_s1 + $0x240] sm:$0xff] }
  0x35   :  { %982 = vmatpush.bf16.msrb.mxu1 %v1749_v63  ;;  %v1243_v63 = vor.u32 %v1703_v56, %v1242_v55 }
  0x36   :  { %969 = vmatpush.bf16.msrb.mxu0 %v1740_v0  ;;  %v1697_v0 = vld [vmem:[%s2276_s0 + $0x24] sm:$0xf] }
  0x37   :  { %997 = vmatpush.bf16.msrb.mxu2 %v1756_v1  ;;  %v1244_v1 = vld [vmem:[%s2276_s0 + $0x54] sm:$0xf0] }
  0x38   :  { %1011 = vmatpush.bf16.msrb.mxu3 %v1764_v2  ;;  %v1251_v2 = vor.u32 %v1704_v58, %v1250_v57 }
  0x39   :  { %983 = vmatpush.bf16.msrb.mxu1 %v1748_v3  ;;  %v1255_v3 = vor.u32 %v1698_v59, %v1252_v60 }
  0x3a   :  { %970 = vmatpush.bf16.msrb.mxu0 %v1739_v4  ;;  %v1247_v4 = vor.u32 %v1697_v0, %v1244_v1 }
  0x3b   :  { %998 = vmatpush.bf16.msrb.mxu2 %v1755_v5  ;;  %v1804_v5 = vld [vmem:[%s2274_s1 + $0x310] sm:$0xff] }
  0x3c   :  { %1012 = vmatpush.bf16.msrb.mxu3 %v1763_v6  ;;  %v1803_v6 = vld [vmem:[%s2274_s1 + $0x308] sm:$0xff] }
  0x3d   :  { %984 = vmatpush.bf16.msrb.mxu1 %v1747_v7  ;;  %v1802_v7 = vld [vmem:[%s2274_s1 + $0x300] sm:$0xff] }
  0x3e   :  { %971 = vmatpush.bf16.msrb.mxu0 %v1738_v8  ;;  %v1258_v8 = vld [vmem:[%s2276_s0 + $0x30] sm:$0xf] }
  0x3f   :  { %999 = vmatpush.bf16.msrb.mxu2 %v1754_v9  ;;  %v1705_v9 = vld [vmem:[%s2276_s0 + $0x60] sm:$0xf0] }
  0x40   :  { %1013 = vmatpush.bf16.msrb.mxu3 %v1762_v10  ;;  %v1259_v10 = vor.u32 %v1705_v9, %v1258_v8 }
  0x41   :  { %985 = vmatpush.bf16.msrb.mxu1 %v1746_v20  ;;  %972 = vmatmul.bf16.vlgmr.msrb.gmra.mxu0 %v1227_v23  ;;  %v1814_v20 = vld [vmem:[%s2275_s2] ss:$0 sm:$0xff] }
  0x42   :  { %1020 = vmatpush.bf16.msra.mxu0 %v1777_v11  ;;  %1000 = vmatmul.bf16.vlgmr.msrb.gmra.mxu2 %v1235_v24 }
  0x43   :  { %1048 = vmatpush.bf16.msra.mxu2 %v1793_v12  ;;  %1014 = vmatmul.bf16.vlgmr.msrb.gmra.mxu3 %v1239_v26 }
  0x44   :  { %1062 = vmatpush.bf16.msra.mxu3 %v1801_v17  ;;  %986 = vmatmul.bf16.vlgmr.msrb.gmra.mxu1 %v1231_v27 }
  0x45   :  { %1034 = vmatpush.bf16.msra.mxu1 %v1785_v25  ;;  %v1809_v25 = vld [vmem:[%s2278_s3 + $0x18] sm:$0xff] }
  0x46   :  { %1021 = vmatpush.bf16.msra.mxu0 %v1776_v28 }
  0x47   :  { %1049 = vmatpush.bf16.msra.mxu2 %v1792_v29 }
  0x48   :  { %1063 = vmatpush.bf16.msra.mxu3 %v1800_v30  ;;  %v1808_v30 = vld [vmem:[%s2278_s3 + $0x10] sm:$0xff] }
  0x49   :  { %1035 = vmatpush.bf16.msra.mxu1 %v1784_v31 }
  0x4a   :  { %1022 = vmatpush.bf16.msra.mxu0 %v1775_v32 }
  0x4b   :  { %1050 = vmatpush.bf16.msra.mxu2 %v1791_v33 }
  0x4c   :  { %1064 = vmatpush.bf16.msra.mxu3 %v1799_v34  ;;  %v1807_v34 = vld [vmem:[%s2278_s3 + $0x8] sm:$0xff] }
  0x4d   :  { %1036 = vmatpush.bf16.msra.mxu1 %v1783_v35 }
  0x4e   :  { %1023 = vmatpush.bf16.msra.mxu0 %v1774_v36 }
  0x4f   :  { %1051 = vmatpush.bf16.msra.mxu2 %v1790_v37 }
  0x50   :  { %1065 = vmatpush.bf16.msra.mxu3 %v1798_v38 }
  0x51   :  { %1037 = vmatpush.bf16.msra.mxu1 %v1782_v39  ;;  %v1806_v39 = vld [vmem:[%s2278_s3] sm:$0xff] }
  0x52   :  { %1024 = vmatpush.bf16.msra.mxu0 %v1773_v40 }
  0x53   :  { %1052 = vmatpush.bf16.msra.mxu2 %v1789_v41 }
  0x54   :  { %1066 = vmatpush.bf16.msra.mxu3 %v1797_v42 }
  0x55   :  { %1038 = vmatpush.bf16.msra.mxu1 %v1781_v43 }
  0x56   :  { %1025 = vmatpush.bf16.msra.mxu0 %v1772_v44 }
  0x57   :  { %1053 = vmatpush.bf16.msra.mxu2 %v1788_v45 }
  0x58   :  { %1067 = vmatpush.bf16.msra.mxu3 %v1796_v46 }
  0x59   :  { %1039 = vmatpush.bf16.msra.mxu1 %v1780_v47 }
  0x5a   :  { %1026 = vmatpush.bf16.msra.mxu0 %v1771_v48 }
  0x5b   :  { %1054 = vmatpush.bf16.msra.mxu2 %v1787_v49 }
  0x5c   :  { %1068 = vmatpush.bf16.msra.mxu3 %v1795_v50 }
  0x5d   :  { %1040 = vmatpush.bf16.msra.mxu1 %v1779_v51 }
  0x5e   :  { %1027 = vmatpush.bf16.msra.mxu0 %v1770_v52 }
  0x5f   :  { %1055 = vmatpush.bf16.msra.mxu2 %v1786_v53 }
  0x60   :  { %1069 = vmatpush.bf16.msra.mxu3 %v1794_v54 }
  0x61   :  { %1041 = vmatpush.bf16.msra.mxu1 %v1778_v62  ;;  %1028 = vmatmul.bf16.vlgmr.msra.gmra.mxu0 %v1243_v63 }
  0x62   :  { %1080 = vmatpush.bf16.msrb.mxu0 %v1805_v61  ;;  %1056 = vmatmul.bf16.vlgmr.msra.gmra.mxu2 %v1251_v2 }
  0x63   :  { %1070 = vmatmul.bf16.vlgmr.msra.gmra.mxu3 %v1255_v3 }
  0x64   :  { %1042 = vmatmul.bf16.vlgmr.msra.gmra.mxu1 %v1247_v4 }
  0x65   :  { %1161 = vmatpush.bf16.msrb.mxu1 %v1813_v13 }
  0x66   :  { %1081 = vmatpush.bf16.msrb.mxu0 %v1804_v5 }
  0x69   :  { %1162 = vmatpush.bf16.msrb.mxu1 %v1812_v15 }
  0x6a   :  { %1082 = vmatpush.bf16.msrb.mxu0 %v1803_v6 }
  0x6d   :  { %1163 = vmatpush.bf16.msrb.mxu1 %v1811_v18 }
  0x6e   :  { %1083 = vmatpush.bf16.msrb.mxu0 %v1802_v7 }
  0x71   :  { %1660 = vmatmul.msk.bf16.vlgmr.msrb.gmra.mxu0 %vm904_vm0, %v1259_v10  ;;  %1164 = vmatpush.bf16.msrb.mxu1 %v1810_v22 }
  0x75   :  { %1165 = vmatpush.bf16.msrb.mxu1 %v1809_v25 }
  0x79   :  { %1166 = vmatpush.bf16.msrb.mxu1 %v1808_v30 }
  0x7d   :  { %1167 = vmatpush.bf16.msrb.mxu1 %v1807_v34 }
  0x81   :  { %1168 = vmatpush.bf16.msrb.mxu1 %v1806_v39 }
  0x9e   :  { %v917_v11 = vpop.f32.mrf.mxu0 }
  0x9f   :  { %v918_v23 = vadd.f32 %v1814_v20, %v917_v11  ;;  %v1815_v11 = vld [vmem:[%s2277_s4] ss:$0 sm:$0xff] }
  0xa1   :  { %v931_v12 = vpop.f32.mrf.mxu1 }
  0xa2   :  { %v932_v27 = vadd.f32 %v931_v12, %v918_v23 }
  0xa5   :  { %v945_v14 = vpop.f32.mrf.mxu2 }
  0xa6   :  { %v919_v16 = vpop.f32.mrf.mxu0  ;;  %v959_v17 = vpop.f32.mrf.mxu3  ;;  %v946_v31 = vadd.f32 %v945_v14, %v932_v27 }
  0xa7   :  { %v920_v29 = vadd.f32 %v1814_v20, %v919_v16 }
  0xa8   :  { %v960_v36 = vadd.f32 %v959_v17, %v946_v31 }
  0xa9   :  { %v933_v19 = vpop.f32.mrf.mxu1 }
  0xaa   :  { %v934_v33 = vadd.f32 %v933_v19, %v920_v29 }
  0xad   :  { %v947_v21 = vpop.f32.mrf.mxu2 }
  0xae   :  { %v961_v26 = vpop.f32.mrf.mxu3  ;;  %v948_v38 = vadd.f32 %v947_v21, %v934_v33 }
  0xb0   :  { %v962_v42 = vadd.f32 %v961_v26, %v948_v38 }
  0xbe   :  { %v973_v24 = vpop.f32.mrf.mxu0 }
  0xbf   :  { %v974_v41 = vadd.f32 %v973_v24, %v960_v36 }
  0xc1   :  { %v987_v28 = vpop.f32.mrf.mxu1 }
  0xc2   :  { %v988_v45 = vadd.f32 %v987_v28, %v974_v41 }
  0xc5   :  { %v1001_v32 = vpop.f32.mrf.mxu2 }
  0xc6   :  { %v975_v35 = vpop.f32.mrf.mxu0  ;;  %v1015_v37 = vpop.f32.mrf.mxu3  ;;  %v1002_v49 = vadd.f32 %v1001_v32, %v988_v45 }
  0xc7   :  { %v976_v46 = vadd.f32 %v975_v35, %v962_v42 }
  0xc8   :  { %v1016_v54 = vadd.f32 %v1015_v37, %v1002_v49 }
  0xc9   :  { %v989_v40 = vpop.f32.mrf.mxu1 }
  0xca   :  { %v990_v50 = vadd.f32 %v989_v40, %v976_v46 }
  0xcd   :  { %v1003_v43 = vpop.f32.mrf.mxu2 }
  0xce   :  { %v1017_v47 = vpop.f32.mrf.mxu3  ;;  %v1004_v51 = vadd.f32 %v1003_v43, %v990_v50 }
  0xd0   :  { %v1018_v55 = vadd.f32 %v1017_v47, %v1004_v51 }
  0xde   :  { %v1029_v44 = vpop.f32.mrf.mxu0 }
  0xdf   :  { %v1030_v56 = vadd.f32 %v1029_v44, %v1016_v54 }
  0xe1   :  { %v1043_v48 = vpop.f32.mrf.mxu1 }
  0xe2   :  { %v1044_v60 = vadd.f32 %v1043_v48, %v1030_v56 }
  0xe5   :  { %v1057_v52 = vpop.f32.mrf.mxu2 }
  0xe6   :  { %v1031_v53 = vpop.f32.mrf.mxu0  ;;  %v1071_v57 = vpop.f32.mrf.mxu3  ;;  %v1058_v63 = vadd.f32 %v1057_v52, %v1044_v60 }
  0xe7   :  { %v1032_v58 = vadd.f32 %v1031_v53, %v1018_v55 }
  0xe8   :  { %v1072_v2 = vadd.f32 %v1071_v57, %v1058_v63 }
  0xe9   :  { %v1045_v59 = vpop.f32.mrf.mxu1 }
  0xea   :  { %v1046_v0 = vadd.f32 %v1045_v59, %v1032_v58 }
  0xed   :  { %v1059_v61 = vpop.f32.mrf.mxu2 }
  0xee   :  { %v1085_v62 = vpop.f32.mrf.mxu0  ;;  %v1060_v1 = vadd.f32 %v1059_v61, %v1046_v0  ;;  %v1073_v3 = vpop.f32.mrf.mxu3 }
  0xef   :  { %v1086_v5 = vadd.f32 %v1085_v62, %v1072_v2 }
  0xf0   :  { %v1074_v4 = vadd.f32 %v1073_v3, %v1060_v1 }
  0xf1   :  { %v1090_v8 = vmax.f32 %v1086_v5, 0.0 }
  0xf6   :  { %v1087_v6 = vpop.f32.mrf.mxu0 }
  0xf7   :  { %v1088_v7 = vadd.f32 %v1087_v6, %v1074_v4 }
  0xf9   :  { %v1091_v9 = vmax.f32 %v1088_v7, 0.0 }
  0xfb   :  { %v1092_v10 = vpack.c.bf16 %v1091_v9, %v1090_v8 }
  0xfd   :  { %1169 = vmatmul.bf16.vlgmr.msrb.gmra.mxu1 %v1092_v10 }
 0x17a   :  { %v1170_v12 = vpop.f32.mrf.mxu1 }
 0x17b   :  { %v1171_v13 = vadd.f32 %v1815_v11, %v1170_v12 }
 0x17d   :  { %v1176_v14 = vsel %vm1175_vm1, %v1171_v13, -inf }
 0x17e   :  { %1177 = vmax.xlane.f32.xlu0 %v1176_v14 }
 0x182   :  { %v1172_v15 = vpop.f32.mrf.mxu1 }
 0x183   :  { %v1173_v16 = vadd.f32 %v1815_v11, %v1172_v15 }
 0x185   :  { %v1179_v17 = vsel %vm1175_vm1, %v1173_v16, -inf }
 0x186   :  { %1180 = vmax.xlane.f32.xlu0 %v1179_v17 }
 0x1f1   :  { %v1178_v18 = vpop.xlane.xlu0 %1177 }
 0x1f2   :  { %v1182_v19 = vsub.f32 %v1171_v13, %v1178_v18 }
 0x1f4   :  { %v1184_v20 = vmul.f32 1.442695, %v1182_v19 }
 0x1f6   :  { %1816 = vpow2.f32 %v1184_v20 }
 0x1f9   :  { %v1181_v21 = vpop.xlane.xlu0 %1180 }
 0x1fa   :  { %v1183_v22 = vsub.f32 %v1173_v16, %v1181_v21 }
 0x1fc   :  { %v1817_v23 = vpop.eup %1816  ;;  %v1186_v24 = vmul.f32 1.442695, %v1183_v22 }
 0x1fd   :  { %v1188_v25 = vsel %vm1175_vm1, %v1817_v23, 0.0 }
 0x1fe   :  { %1818 = vpow2.f32 %v1186_v24  ;;  %1189 = vadd.xlane.f32.xlu1 %v1188_v25 }
 0x204   :  { %v1819_v26 = vpop.eup %1818 }
 0x205   :  { %v1191_v27 = vsel %vm1175_vm1, %v1819_v26, 0.0 }
 0x206   :  { %1192 = vadd.xlane.f32.xlu1 %v1191_v27 }
 0x271   :  { %v1190_v28 = vpop.xlane.xlu1 %1189 }
 0x272   :  { %1820 = vlog2.f32 %v1190_v28 }
 0x278   :  { %v1821_v29 = vpop.eup %1820 }
 0x279   :  { %v1195_v30 = vmul.f32 0.6931472, %v1821_v29  ;;  %v1193_v31 = vpop.xlane.xlu1 %1192 }
 0x27a   :  { %1822 = vlog2.f32 %v1193_v31 }
 0x27b   :  { %v1198_v32 = vadd.f32 %v1195_v30, %v1178_v18 }
 0x27d   :  { %v1200_v33 = vsub.f32 %v1171_v13, %v1198_v32 }
 0x27f   :  { %1202 = vst.msk [vmem:[%s2279_s5] sm:$0xff] %vm1175_vm1, %v1200_v33 }
 0x280   :  { %v1823_v34 = vpop.eup %1822 }
 0x281   :  { %v1197_v35 = vmul.f32 0.6931472, %v1823_v34 }
 0x283   :  { %v1199_v36 = vadd.f32 %v1197_v35, %v1181_v21 }
 0x285   :  { %v1201_v37 = vsub.f32 %v1173_v16, %v1199_v36 }
 0x287   :  { %1203 = vst.msk [vmem:[%s2279_s5 + $0x8] sm:$0xff] %vm1175_vm1, %v1201_v37 }

</bundles_post_ra>
